<compile_context>
chip_gen: v7x
topology: tpu7x:2x2x1
jax: 0.10.0
libtpu: 0.0.40
codegen_flags: <defaults>
</compile_context>

<pallas_src>
import math
from functools import partial

import jax
import jax.numpy as jnp
from jax.experimental import pallas as pl
from jax.experimental.pallas import tpu as pltpu


def _flash_kernel(*refs, scale, causal, has_kv_bias, has_q_mask,
                  block_q, block_k, num_groups, sq, sk,
                  f32_matmul, approx_recip):
    # refs: q, k, v, [kv_bias], [q_mask], o, q_sc, m_sc, l_sc, acc_sc
    idx = 0
    q_ref = refs[idx]; idx += 1          # (1, G, bq, D)  native dtype
    k_ref = refs[idx]; idx += 1          # (1, 1, bk, D)  native dtype
    v_ref = refs[idx]; idx += 1          # (1, 1, bk, D)  native dtype
    kv_bias_ref = None
    q_mask_ref = None
    if has_kv_bias:
        kv_bias_ref = refs[idx]; idx += 1    # (1, 1, 1, bk) f32, 0 / -1e30
    if has_q_mask:
        q_mask_ref = refs[idx]; idx += 1     # (1, 1, bq, 1) f32, 1 = valid row
    o_ref = refs[idx]; idx += 1              # (1, G, bq, D)
    q_sc, m_sc, l_sc, acc_sc = refs[idx:idx + 4]
    # q_sc: (G*bq, D) native dtype (pre-scaled), m/l: (G*bq, 1) f32,
    # acc: (G*bq, D) f32

    qi = pl.program_id(2)
    ki = pl.program_id(3)
    rows = num_groups * block_q
    precision = jax.lax.Precision.HIGHEST if f32_matmul else None

    @pl.when(ki == 0)
    def _init():
        qv = q_ref[0].astype(jnp.float32) * scale         # scale once, in fp32
        q_sc[...] = qv.reshape(q_sc.shape).astype(q_sc.dtype)
        m_sc[...] = jnp.full_like(m_sc, -1e30)
        l_sc[...] = jnp.zeros_like(l_sc)
        acc_sc[...] = jnp.zeros_like(acc_sc)

    def _tile(mask_causal):
        q = q_sc[...]                                      # (rows, D)
        k = k_ref[0, 0]                                    # (bk, D)
        v = v_ref[0, 0]                                    # (bk, D)

        # QK^T: single 2D MXU matmul, contracting last dims (no k.T copy).
        s = jax.lax.dot_general(
            q, k, (((1,), (1,)), ((), ())),
            preferred_element_type=jnp.float32,
            precision=precision)                           # (rows, bk) f32

        if has_kv_bias:
            s = s + kv_bias_ref[0, 0]                      # additive 0/-1e30

        if mask_causal:
            # Only on diagonal-straddling tiles.  Bottom-right aligned causal
            # mask on original (padded) positions; row index within the
            # flattened (g, q) rows is (row % bq).
            local_q = jax.lax.broadcasted_iota(
                jnp.int32, (rows, block_k), 0) % block_q
            col = jax.lax.broadcasted_iota(jnp.int32, (rows, block_k), 1)
            allowed = (ki * block_k + col) - (qi * block_q + local_q) <= (sk - sq)
            s = jnp.where(allowed, s, -1e30)

        # Online softmax update (fp32 state).
        m_prev = m_sc[...]
        m_new = jnp.maximum(m_prev, jnp.max(s, axis=-1, keepdims=True))
        alpha = jnp.exp(m_prev - m_new)
        p = jnp.exp(s - m_new)
        l_sc[...] = alpha * l_sc[...] + jnp.sum(p, axis=-1, keepdims=True)
        acc_sc[...] = alpha * acc_sc[...] + jax.lax.dot_general(
            p.astype(v.dtype), v, (((1,), (0,)), ((), ())),
            preferred_element_type=jnp.float32,
            precision=precision)                           # (rows, D) f32
        m_sc[...] = m_new

    if causal:
        tile_k0 = ki * block_k
        tile_k1 = tile_k0 + block_k - 1
        row_last_allowed = qi * block_q + (block_q - 1) + (sk - sq)
        needed = tile_k0 <= row_last_allowed
        # Tile entirely below the diagonal -> no per-element causal masking.
        fully_allowed = tile_k1 <= qi * block_q + (sk - sq)
        pl.when(jnp.logical_and(needed, fully_allowed))(lambda: _tile(False))
        pl.when(jnp.logical_and(needed, jnp.logical_not(fully_allowed)))(
            lambda: _tile(True))
    else:
        _tile(False)

    @pl.when(ki == pl.num_programs(3) - 1)
    def _finalize():
        if approx_recip:
            inv_l = pl.reciprocal(l_sc[...], approx=True)
        else:
            inv_l = 1.0 / l_sc[...]
        # Rows that never saw a valid key (fully masked / fully skipped) -> 0.
        inv_l = jnp.where(m_sc[...] > -1e29, inv_l, 0.0)
        out = (acc_sc[...] * inv_l).reshape(o_ref.shape[1:])   # (G, bq, D)
        if has_q_mask:
            out = out * q_mask_ref[0, 0][None]                 # (1, bq, 1)
        o_ref[0] = out.astype(o_ref.dtype)


def _vmem_capacity_bytes():
    try:
        return int(pltpu.get_tpu_info().vmem_capacity_bytes)
    except Exception:
        return 128 * 1024 * 1024


def _choose_block_sizes(sq, sk, num_groups, head_dim, vmem_budget_bytes):
    """Pick tiles that feed the 256-wide MXU and fit the per-gen VMEM budget."""
    g = max(num_groups, 1)
    bq = max(8, min(sq, max(128, 512 // g)))
    bk = min(sk, 1024)

    def footprint(bq_, bk_):
        rows = g * bq_
        score = 3 * rows * bk_ * 4                       # s, p, mask temps (f32)
        state = rows * (head_dim + 2) * 4                # acc + m + l
        qs = rows * head_dim * 4                         # scaled-Q scratch
        io = 2 * (rows * head_dim + 2 * bk_ * head_dim) * 4   # dbl-buffered Q,K,V
        return score + state + qs + io

    while footprint(bq, bk) > vmem_budget_bytes and bk > 128:
        bk //= 2
    while footprint(bq, bk) > vmem_budget_bytes and bq > 64:
        bq //= 2
    return bq, bk


def flash_attention_forward(query_states, key_states, value_states,
                            attention_mask=None, causal=False,
                            softmax_scale=None, block_q=None, block_k=None):
    B, sq, H, D = query_states.shape
    _, sk, KVH, Dk = key_states.shape
    assert D == Dk and H % KVH == 0
    G = H // KVH
    if softmax_scale is None:
        softmax_scale = 1.0 / math.sqrt(D)

    # Generation-aware VMEM sizing (64 MiB/TC on v7x, 128 MiB on v5e/v6e).
    vmem_cap = _vmem_capacity_bytes()
    vmem_limit = max(32 * 1024 * 1024,
                     min(int(vmem_cap * 0.7), 100 * 1024 * 1024))

    bq_auto, bk_auto = _choose_block_sizes(sq, sk, G, D, int(vmem_limit * 0.6))
    bq = min(block_q or bq_auto, sq)
    if bq < sq:                       # (8,128) rule: sublane blocks %8 or full
        bq = max(8, (bq // 8) * 8)
    bk = min(block_k or bk_auto, sk)
    if bk < sk:
        bk = max(8, (bk // 8) * 8)

    n_q = pl.cdiv(sq, bq)
    n_k = pl.cdiv(sk, bk)
    sq_pad = n_q * bq
    sk_pad = n_k * bk

    has_kv_bias = (attention_mask is not None) or (sk_pad != sk)
    has_q_mask = (attention_mask is not None) and (sq != 1)

    # Head-major layout for per-(kv-head) tiling.
    qt = jnp.transpose(query_states, (0, 2, 1, 3))    # [B, H,   Sq, D]
    kt = jnp.transpose(key_states, (0, 2, 1, 3))      # [B, KVH, Sk, D]
    vt = jnp.transpose(value_states, (0, 2, 1, 3))
    if sk_pad != sk:
        # Zero-pad ragged KV so the kernel never multiplies garbage V rows.
        pad = ((0, 0), (0, 0), (0, sk_pad - sk), (0, 0))
        kt = jnp.pad(kt, pad)
        vt = jnp.pad(vt, pad)

    if causal:
        def kv_block(qi, ki):
            # Clamp fully-skipped (above-diagonal) KV tiles to the last needed
            # tile so Pallas's block-revisit optimization elides their DMAs.
            last_needed = jnp.maximum((qi * bq + bq - 1 + (sk - sq)) // bk, 0)
            return jnp.minimum(ki, last_needed)
    else:
        def kv_block(qi, ki):
            return ki

    operands = [qt, kt, vt]
    in_specs = [
        pl.BlockSpec((1, G, bq, D), lambda b, kvh, qi, ki: (b, kvh, qi, 0)),
        pl.BlockSpec((1, 1, bk, D),
                     lambda b, kvh, qi, ki: (b, kvh, kv_block(qi, ki), 0)),
        pl.BlockSpec((1, 1, bk, D),
                     lambda b, kvh, qi, ki: (b, kvh, kv_block(qi, ki), 0)),
    ]

    if has_kv_bias:
        if attention_mask is None:
            kv_valid = jnp.ones((B, sk), jnp.float32)
        else:
            kv_valid = attention_mask.astype(jnp.float32)
        kv_valid = jnp.pad(kv_valid, ((0, 0), (0, sk_pad - sk)))
        kv_bias = jnp.where(kv_valid > 0.0, 0.0, -1e30).astype(jnp.float32)
        kv_bias = kv_bias.reshape(B, n_k, 1, bk)
        operands.append(kv_bias)
        in_specs.append(pl.BlockSpec(
            (1, 1, 1, bk), lambda b, kvh, qi, ki: (b, kv_block(qi, ki), 0, 0)))

    if has_q_mask:
        am = attention_mask.astype(jnp.float32)
        # HF convention: for sq < sk the queries are the last sq positions.
        q_valid = am if sq == sk else am[:, -sq:]
        q_valid = jnp.pad(q_valid, ((0, 0), (0, sq_pad - sq)))
        q_valid = q_valid.reshape(B, n_q, bq, 1)
        operands.append(q_valid)
        in_specs.append(pl.BlockSpec(
            (1, 1, bq, 1), lambda b, kvh, qi, ki: (b, qi, 0, 0)))

    rows = G * bq
    kernel = partial(
        _flash_kernel,
        scale=float(softmax_scale), causal=causal,
        has_kv_bias=has_kv_bias, has_q_mask=has_q_mask,
        block_q=bq, block_k=bk, num_groups=G, sq=sq, sk=sk,
        f32_matmul=(qt.dtype == jnp.float32),
        approx_recip=(query_states.dtype != jnp.float32))

    out = pl.pallas_call(
        kernel,
        out_shape=jax.ShapeDtypeStruct((B, H, sq, D), query_states.dtype),
        grid_spec=pltpu.PrefetchScalarGridSpec(
            num_scalar_prefetch=0,
            grid=(B, KVH, n_q, n_k),
            in_specs=in_specs,
            out_specs=pl.BlockSpec((1, G, bq, D),
                                   lambda b, kvh, qi, ki: (b, kvh, qi, 0)),
            scratch_shapes=[
                pltpu.VMEM((rows, D), qt.dtype),       # pre-scaled Q (group-flat)
                pltpu.VMEM((rows, 1), jnp.float32),    # running max
                pltpu.VMEM((rows, 1), jnp.float32),    # running sum
                pltpu.VMEM((rows, D), jnp.float32),    # output accumulator
            ]),
        compiler_params=pltpu.CompilerParams(
            dimension_semantics=("parallel", "parallel", "parallel", "arbitrary"),
            vmem_limit_bytes=int(vmem_limit)),
    )(*operands)

    return jnp.transpose(out, (0, 2, 1, 3))           # back to [B, Sq, H, D]


class FlashAttention:
    """Mirror of the PyTorch module (no parameters)."""

    def __init__(self, hidden_size, num_attention_heads, num_key_value_heads):
        self.hidden_size = hidden_size
        self.num_heads = num_attention_heads
        self.head_dim = hidden_size // num_attention_heads
        self.num_key_value_heads = num_key_value_heads
        self.num_key_value_groups = num_attention_heads // num_key_value_heads

    def __call__(self, query_states, key_states, value_states,
                 attention_mask=None, causal=False, **kwargs):
        return flash_attention_forward(query_states, key_states, value_states,
                                       attention_mask=attention_mask,
                                       causal=causal, **kwargs)


def _reference(q, k, v, mask, causal):
    B, sq, H, D = q.shape
    _, sk, KVH, _ = k.shape
    g = H // KVH
    hp = jax.lax.Precision.HIGHEST
    kr = jnp.repeat(k, g, axis=2).astype(jnp.float32)
    vr = jnp.repeat(v, g, axis=2).astype(jnp.float32)
    qf = q.astype(jnp.float32)
    s = jnp.einsum('bqhd,bkhd->bhqk', qf, kr, precision=hp) / math.sqrt(D)
    if mask is not None:
        s = jnp.where(mask[:, None, None, :] > 0, s, -1e30)
    if causal:
        qi = jnp.arange(sq)[:, None]
        ki = jnp.arange(sk)[None, :]
        s = jnp.where(ki <= qi + (sk - sq), s, -1e30)
    p = jax.nn.softmax(s, axis=-1)
    o = jnp.einsum('bhqk,bkhd->bqhd', p, vr, precision=hp)
    if mask is not None and sq == sk:
        o = o * mask[:, :, None, None].astype(jnp.float32)
    return o.astype(q.dtype)


if __name__ == "__main__":
    # small shapes: hidden=128, heads=4 (head_dim=32), kv_heads=2, batch=2, seq=16
    B, S, H, KVH, D = 2, 16, 4, 2, 32
    module = FlashAttention(H * D, H, KVH)

    key = jax.random.PRNGKey(0)
    kq, kk, kv_, kq2, kk2, kv2 = jax.random.split(key, 6)
    q = jax.random.normal(kq, (B, S, H, D), dtype=jnp.float32)
    k = jax.random.normal(kk, (B, S, KVH, D), dtype=jnp.float32)
    v = jax.random.normal(kv_, (B, S, KVH, D), dtype=jnp.float32)

    # right-padded attention mask: batch 0 fully valid, batch 1 has 11 valid tokens
    lengths = jnp.array([S, 11], dtype=jnp.int32)
    mask = (jnp.arange(S)[None, :] < lengths[:, None]).astype(jnp.int32)

    out = jax.block_until_ready(module(q, k, v, attention_mask=mask))
    ref = _reference(q, k, v, mask, causal=False)
    assert out.shape == (B, S, H, D)
    assert float(jnp.max(jnp.abs(out - ref))) < 2e-3, \
        float(jnp.max(jnp.abs(out - ref)))

    # no-mask path (mask-free fast path: no kv-bias / q-mask operands at all)
    out2 = jax.block_until_ready(module(q, k, v, attention_mask=None))
    ref2 = _reference(q, k, v, None, causal=False)
    assert float(jnp.max(jnp.abs(out2 - ref2))) < 2e-3, \
        float(jnp.max(jnp.abs(out2 - ref2)))

    # multi-tile path: exercises online softmax across KV tiles, accumulator
    # init/finalize, causal tile skipping and the clamped KV index map.
    S2 = 32
    q2 = jax.random.normal(kq2, (B, S2, H, D), dtype=jnp.float32)
    k2 = jax.random.normal(kk2, (B, S2, KVH, D), dtype=jnp.float32)
    v2 = jax.random.normal(kv2, (B, S2, KVH, D), dtype=jnp.float32)
    lengths2 = jnp.array([S2, 23], dtype=jnp.int32)
    mask2 = (jnp.arange(S2)[None, :] < lengths2[:, None]).astype(jnp.int32)

    out3 = jax.block_until_ready(
        flash_attention_forward(q2, k2, v2, attention_mask=mask2,
                                causal=False, block_q=8, block_k=8))
    ref3 = _reference(q2, k2, v2, mask2, causal=False)
    assert float(jnp.max(jnp.abs(out3 - ref3))) < 2e-3, \
        float(jnp.max(jnp.abs(out3 - ref3)))

    out4 = jax.block_until_ready(
        flash_attention_forward(q2, k2, v2, attention_mask=mask2,
                                causal=True, block_q=8, block_k=8))
    ref4 = _reference(q2, k2, v2, mask2, causal=True)
    assert float(jnp.max(jnp.abs(out4 - ref4))) < 2e-3, \
        float(jnp.max(jnp.abs(out4 - ref4)))

    print("KERNEL_OK")
</pallas_src>

<mosaic_0001>
module attributes {stable_mosaic.version = 11 : i64} {
  func.func @_flash_kernel(%arg0: i32, %arg1: i32, %arg2: i32, %arg3: i32, %arg4: memref<1x2x16x32xf32, #tpu.memory_space<vmem>>, %arg5: memref<1x1x16x32xf32, #tpu.memory_space<vmem>>, %arg6: memref<1x1x16x32xf32, #tpu.memory_space<vmem>>, %arg7: memref<1x1x1x16xf32, #tpu.memory_space<vmem>>, %arg8: memref<1x1x16x1xf32, #tpu.memory_space<vmem>>, %arg9: memref<1x2x16x32xf32, #tpu.memory_space<vmem>>, %arg10: memref<32x32xf32, #tpu.memory_space<vmem>>, %arg11: memref<32x1xf32, #tpu.memory_space<vmem>>, %arg12: memref<32x1xf32, #tpu.memory_space<vmem>>, %arg13: memref<32x32xf32, #tpu.memory_space<vmem>>) attributes {dimension_semantics = [#tpu.dimension_semantics<parallel>, #tpu.dimension_semantics<parallel>, #tpu.dimension_semantics<parallel>, #tpu.dimension_semantics<arbitrary>], iteration_bounds = array<i64: 2, 2, 1, 1>, scalar_prefetch = 0 : i64, scratch_operands = 4 : i64, tpu.core_type = #tpu.core_type<tc>, window_params = [{transform_indices = @transform_0, window_bounds = array<i64: 1, 2, 16, 32>}, {transform_indices = @transform_1, window_bounds = array<i64: 1, 1, 16, 32>}, {transform_indices = @transform_2, window_bounds = array<i64: 1, 1, 16, 32>}, {transform_indices = @transform_3, window_bounds = array<i64: 1, 1, 1, 16>}, {transform_indices = @transform_4, window_bounds = array<i64: 1, 1, 16, 1>}, {transform_indices = @transform_5, window_bounds = array<i64: 1, 2, 16, 32>}]} {
    %c0_i32 = arith.constant 0 : i32
    %0 = arith.cmpi eq, %arg3, %c0_i32 : i32
    %1 = arith.extui %0 : i1 to i32
    %c0_i32_0 = arith.constant 0 : i32
    %2 = arith.cmpi ne, %1, %c0_i32_0 : i32
    scf.if %2 {
      %c0_31 = arith.constant 0 : index
      %c0_32 = arith.constant 0 : index
      %c0_33 = arith.constant 0 : index
      %c0_34 = arith.constant 0 : index
      %38 = vector.load %arg4[%c0_31, %c0_32, %c0_33, %c0_34] : memref<1x2x16x32xf32, #tpu.memory_space<vmem>>, vector<1x2x16x32xf32>
      %39 = vector.shape_cast %38 : vector<1x2x16x32xf32> to vector<2x16x32xf32>
      %cst_35 = arith.constant 0.176776692 : f32
      %40 = vector.broadcast %cst_35 : f32 to vector<2x16x32xf32>
      %41 = arith.mulf %39, %40 : vector<2x16x32xf32>
      %42 = vector.shape_cast %41 : vector<2x16x32xf32> to vector<32x32xf32>
      %c0_36 = arith.constant 0 : index
      %c0_37 = arith.constant 0 : index
      %43 = vector.load %arg10[%c0_36, %c0_37] : memref<32x32xf32, #tpu.memory_space<vmem>>, vector<32x32xf32>
      tpu.vector_store %arg10[%c0_36, %c0_37], %42 {strides = array<i32>} : memref<32x32xf32, #tpu.memory_space<vmem>>, vector<32x32xf32>,
      %cst_38 = arith.constant -1.000000e+30 : f32
      %44 = vector.broadcast %cst_38 : f32 to vector<32x1xf32>
      %c0_39 = arith.constant 0 : index
      %c0_40 = arith.constant 0 : index
      %45 = vector.load %arg11[%c0_39, %c0_40] : memref<32x1xf32, #tpu.memory_space<vmem>>, vector<32x1xf32>
      tpu.vector_store %arg11[%c0_39, %c0_40], %44 {strides = array<i32>} : memref<32x1xf32, #tpu.memory_space<vmem>>, vector<32x1xf32>,
      %cst_41 = arith.constant 0.000000e+00 : f32
      %46 = vector.broadcast %cst_41 : f32 to vector<32x1xf32>
      %c0_42 = arith.constant 0 : index
      %c0_43 = arith.constant 0 : index
      %47 = vector.load %arg12[%c0_42, %c0_43] : memref<32x1xf32, #tpu.memory_space<vmem>>, vector<32x1xf32>
      tpu.vector_store %arg12[%c0_42, %c0_43], %46 {strides = array<i32>} : memref<32x1xf32, #tpu.memory_space<vmem>>, vector<32x1xf32>,
      %cst_44 = arith.constant 0.000000e+00 : f32
      %48 = vector.broadcast %cst_44 : f32 to vector<32x32xf32>
      %c0_45 = arith.constant 0 : index
      %c0_46 = arith.constant 0 : index
      %49 = vector.load %arg13[%c0_45, %c0_46] : memref<32x32xf32, #tpu.memory_space<vmem>>, vector<32x32xf32>
      tpu.vector_store %arg13[%c0_45, %c0_46], %48 {strides = array<i32>} : memref<32x32xf32, #tpu.memory_space<vmem>>, vector<32x32xf32>,
    } else {
    }
    %c0 = arith.constant 0 : index
    %c0_1 = arith.constant 0 : index
    %3 = vector.load %arg10[%c0, %c0_1] : memref<32x32xf32, #tpu.memory_space<vmem>>, vector<32x32xf32>
    %c0_2 = arith.constant 0 : index
    %c0_3 = arith.constant 0 : index
    %c0_4 = arith.constant 0 : index
    %c0_5 = arith.constant 0 : index
    %4 = vector.load %arg5[%c0_2, %c0_3, %c0_4, %c0_5] : memref<1x1x16x32xf32, #tpu.memory_space<vmem>>, vector<1x1x16x32xf32>
    %5 = vector.shape_cast %4 : vector<1x1x16x32xf32> to vector<16x32xf32>
    %c0_6 = arith.constant 0 : index
    %c0_7 = arith.constant 0 : index
    %c0_8 = arith.constant 0 : index
    %c0_9 = arith.constant 0 : index
    %6 = vector.load %arg6[%c0_6, %c0_7, %c0_8, %c0_9] : memref<1x1x16x32xf32, #tpu.memory_space<vmem>>, vector<1x1x16x32xf32>
    %7 = vector.shape_cast %6 : vector<1x1x16x32xf32> to vector<16x32xf32>
    %cst = arith.constant dense<0.000000e+00> : vector<32x16xf32>
    %8 = tpu.matmul %3, %5, %cst {dimension_numbers = #tpu.dot_dimension_numbers<[1], [1], [0], [0], [0, 0, 1, 0], [], []>, precision = #tpu.contract_precision<fp32>} : vector<32x32xf32>, vector<16x32xf32>, vector<32x16xf32> -> vector<32x16xf32>
    %c0_10 = arith.constant 0 : index
    %c0_11 = arith.constant 0 : index
    %c0_12 = arith.constant 0 : index
    %c0_13 = arith.constant 0 : index
    %9 = vector.load %arg7[%c0_10, %c0_11, %c0_12, %c0_13] : memref<1x1x1x16xf32, #tpu.memory_space<vmem>>, vector<1x1x1x16xf32>
    %10 = vector.shape_cast %9 : vector<1x1x1x16xf32> to vector<1x16xf32>
    %11 = vector.broadcast %10 : vector<1x16xf32> to vector<32x16xf32>
    %12 = arith.addf %8, %11 : vector<32x16xf32>
    %c0_14 = arith.constant 0 : index
    %c0_15 = arith.constant 0 : index
    %13 = vector.load %arg11[%c0_14, %c0_15] : memref<32x1xf32, #tpu.memory_space<vmem>>, vector<32x1xf32>
    %cst_16 = arith.constant dense<0xFF800000> : vector<32xf32>
    %14 = vector.multi_reduction <maximumf>, %12, %cst_16 [1] : vector<32x16xf32> to vector<32xf32>
    %15 = vector.shape_cast %14 : vector<32xf32> to vector<32x1xf32>
    %16 = arith.maximumf %13, %15 : vector<32x1xf32>
    %17 = arith.subf %13, %16 : vector<32x1xf32>
    %18 = math.exp %17 : vector<32x1xf32>
    %19 = vector.broadcast %16 : vector<32x1xf32> to vector<32x16xf32>
    %20 = arith.subf %12, %19 : vector<32x16xf32>
    %21 = math.exp %20 : vector<32x16xf32>
    %c0_17 = arith.constant 0 : index
    %c0_18 = arith.constant 0 : index
    %22 = vector.load %arg12[%c0_17, %c0_18] : memref<32x1xf32, #tpu.memory_space<vmem>>, vector<32x1xf32>
    %23 = arith.mulf %18, %22 : vector<32x1xf32>
    %cst_19 = arith.constant dense<0.000000e+00> : vector<32xf32>
    %24 = vector.multi_reduction <add>, %21, %cst_19 [1] : vector<32x16xf32> to vector<32xf32>
    %25 = vector.shape_cast %24 : vector<32xf32> to vector<32x1xf32>
    %26 = arith.addf %23, %25 : vector<32x1xf32>
    %c0_20 = arith.constant 0 : index
    %c0_21 = arith.constant 0 : index
    %27 = vector.load %arg12[%c0_20, %c0_21] : memref<32x1xf32, #tpu.memory_space<vmem>>, vector<32x1xf32>
    tpu.vector_store %arg12[%c0_20, %c0_21], %26 {strides = array<i32>} : memref<32x1xf32, #tpu.memory_space<vmem>>, vector<32x1xf32>,
    %c0_22 = arith.constant 0 : index
    %c0_23 = arith.constant 0 : index
    %28 = vector.load %arg13[%c0_22, %c0_23] : memref<32x32xf32, #tpu.memory_space<vmem>>, vector<32x32xf32>
    %29 = vector.broadcast %18 : vector<32x1xf32> to vector<32x32xf32>
    %30 = arith.mulf %29, %28 : vector<32x32xf32>
    %cst_24 = arith.constant dense<0.000000e+00> : vector<32x32xf32>
    %31 = tpu.matmul %21, %7, %cst_24 {dimension_numbers = #tpu.dot_dimension_numbers<[1], [0], [0], [1], [0, 0, 1, 1], [], []>, precision = #tpu.contract_precision<fp32>} : vector<32x16xf32>, vector<16x32xf32>, vector<32x32xf32> -> vector<32x32xf32>
    %32 = arith.addf %30, %31 : vector<32x32xf32>
    %c0_25 = arith.constant 0 : index
    %c0_26 = arith.constant 0 : index
    %33 = vector.load %arg13[%c0_25, %c0_26] : memref<32x32xf32, #tpu.memory_space<vmem>>, vector<32x32xf32>
    tpu.vector_store %arg13[%c0_25, %c0_26], %32 {strides = array<i32>} : memref<32x32xf32, #tpu.memory_space<vmem>>, vector<32x32xf32>,
    %c0_27 = arith.constant 0 : index
    %c0_28 = arith.constant 0 : index
    %34 = vector.load %arg11[%c0_27, %c0_28] : memref<32x1xf32, #tpu.memory_space<vmem>>, vector<32x1xf32>
    tpu.vector_store %arg11[%c0_27, %c0_28], %16 {strides = array<i32>} : memref<32x1xf32, #tpu.memory_space<vmem>>, vector<32x1xf32>,
    %c0_i32_29 = arith.constant 0 : i32
    %35 = arith.cmpi eq, %arg3, %c0_i32_29 : i32
    %36 = arith.extui %35 : i1 to i32
    %c0_i32_30 = arith.constant 0 : i32
    %37 = arith.cmpi ne, %36, %c0_i32_30 : i32
    scf.if %37 {
      %c0_31 = arith.constant 0 : index
      %c0_32 = arith.constant 0 : index
      %38 = vector.load %arg12[%c0_31, %c0_32] : memref<32x1xf32, #tpu.memory_space<vmem>>, vector<32x1xf32>
      %cst_33 = arith.constant 1.000000e+00 : f32
      %39 = vector.broadcast %cst_33 : f32 to vector<32x1xf32>
      %40 = arith.divf %39, %38 : vector<32x1xf32>
      %c0_34 = arith.constant 0 : index
      %c0_35 = arith.constant 0 : index
      %41 = vector.load %arg11[%c0_34, %c0_35] : memref<32x1xf32, #tpu.memory_space<vmem>>, vector<32x1xf32>
      %cst_36 = arith.constant -1.000000e+29 : f32
      %42 = vector.broadcast %cst_36 : f32 to vector<32x1xf32>
      %43 = arith.cmpf ogt, %41, %42 : vector<32x1xf32>
      %cst_37 = arith.constant 0.000000e+00 : f32
      %44 = vector.broadcast %cst_37 : f32 to vector<32x1xf32>
      %45 = arith.select %43, %40, %44 : vector<32x1xi1>, vector<32x1xf32>
      %c0_38 = arith.constant 0 : index
      %c0_39 = arith.constant 0 : index
      %46 = vector.load %arg13[%c0_38, %c0_39] : memref<32x32xf32, #tpu.memory_space<vmem>>, vector<32x32xf32>
      %47 = vector.broadcast %45 : vector<32x1xf32> to vector<32x32xf32>
      %48 = arith.mulf %46, %47 : vector<32x32xf32>
      %49 = vector.shape_cast %48 : vector<32x32xf32> to vector<2x16x32xf32>
      %c0_40 = arith.constant 0 : index
      %c0_41 = arith.constant 0 : index
      %c0_42 = arith.constant 0 : index
      %c0_43 = arith.constant 0 : index
      %50 = vector.load %arg8[%c0_40, %c0_41, %c0_42, %c0_43] : memref<1x1x16x1xf32, #tpu.memory_space<vmem>>, vector<1x1x16x1xf32>
      %51 = vector.shape_cast %50 : vector<1x1x16x1xf32> to vector<16x1xf32>
      %52 = vector.shape_cast %51 : vector<16x1xf32> to vector<1x16x1xf32>
      %53 = vector.broadcast %52 : vector<1x16x1xf32> to vector<2x16x32xf32>
      %54 = arith.mulf %49, %53 : vector<2x16x32xf32>
      %c0_44 = arith.constant 0 : index
      %c0_45 = arith.constant 0 : index
      %c0_46 = arith.constant 0 : index
      %c0_47 = arith.constant 0 : index
      %55 = vector.load %arg9[%c0_44, %c0_45, %c0_46, %c0_47] : memref<1x2x16x32xf32, #tpu.memory_space<vmem>>, vector<1x2x16x32xf32>
      %56 = vector.shape_cast %55 : vector<1x2x16x32xf32> to vector<2x16x32xf32>
      %57 = vector.shape_cast %54 : vector<2x16x32xf32> to vector<1x2x16x32xf32>
      tpu.vector_store %arg9[%c0_44, %c0_45, %c0_46, %c0_47], %57 {strides = array<i32>} : memref<1x2x16x32xf32, #tpu.memory_space<vmem>>, vector<1x2x16x32xf32>,
    } else {
    }
    return
  }
  func.func @transform_0(%arg0: i32, %arg1: i32, %arg2: i32, %arg3: i32) -> (i32, i32, i32, i32) {
    %c0_i32 = arith.constant 0 : i32
    %c0_i32_0 = arith.constant 0 : i32
    return %arg0, %arg1, %arg2, %c0_i32 : i32, i32, i32, i32
  }
  func.func @transform_1(%arg0: i32, %arg1: i32, %arg2: i32, %arg3: i32) -> (i32, i32, i32, i32) {
    %c0_i32 = arith.constant 0 : i32
    %c0_i32_0 = arith.constant 0 : i32
    return %arg0, %arg1, %arg3, %c0_i32 : i32, i32, i32, i32
  }
  func.func @transform_2(%arg0: i32, %arg1: i32, %arg2: i32, %arg3: i32) -> (i32, i32, i32, i32) {
    %c0_i32 = arith.constant 0 : i32
    %c0_i32_0 = arith.constant 0 : i32
    return %arg0, %arg1, %arg3, %c0_i32 : i32, i32, i32, i32
  }
  func.func @transform_3(%arg0: i32, %arg1: i32, %arg2: i32, %arg3: i32) -> (i32, i32, i32, i32) {
    %c0_i32 = arith.constant 0 : i32
    %c0_i32_0 = arith.constant 0 : i32
    %c0_i32_1 = arith.constant 0 : i32
    return %arg0, %arg3, %c0_i32, %c0_i32_0 : i32, i32, i32, i32
  }
  func.func @transform_4(%arg0: i32, %arg1: i32, %arg2: i32, %arg3: i32) -> (i32, i32, i32, i32) {
    %c0_i32 = arith.constant 0 : i32
    %c0_i32_0 = arith.constant 0 : i32
    %c0_i32_1 = arith.constant 0 : i32
    return %arg0, %arg2, %c0_i32, %c0_i32_0 : i32, i32, i32, i32
  }
  func.func @transform_5(%arg0: i32, %arg1: i32, %arg2: i32, %arg3: i32) -> (i32, i32, i32, i32) {
    %c0_i32 = arith.constant 0 : i32
    %c0_i32_0 = arith.constant 0 : i32
    return %arg0, %arg1, %arg2, %c0_i32 : i32, i32, i32, i32
  }
}

</mosaic_0001>

<bundles_post_ra>
// kernel: tpu_custom_call.1
= control target key start
LH: loop header
LB: loop body
LE: loop exit
PB: predicated region body
PF: predicated region fallthrough
CT: control target
= control target key end

     0   :  { %s3567_s0 = inlined_call_operand.hbm [shape: f32[2,4,16,32], index: 0, kind: input, shape index: {}]   ;;  %s3568_s1 = inlined_call_operand.hbm [shape: f32[2,2,16,32], index: 1, kind: input, shape index: {}]   ;;  %s3569_s2 = inlined_call_operand.hbm [shape: f32[2,2,16,32], index: 2, kind: input, shape index: {}]   ;;  %s3570_s3 = inlined_call_operand.hbm [shape: f32[2,1,1,16], index: 3, kind: input, shape index: {}]   ;;  %s3571_s4 = inlined_call_operand.hbm [shape: f32[2,1,16,1], index: 4, kind: input, shape index: {}]   ;;  %s3572_s5 = inlined_call_operand.hbm [shape: f32[2,4,16,32], index: 5, kind: output, shape index: {}]  }
   0x1   :  { %3609 = sst [smem:[#allocation35_spill]] %s3568_s1 }
   0x2   :  { %3610 = sst [smem:[#allocation36_spill]] %s3570_s3 }
   0x3   :  { %3611 = sst [smem:[#allocation37_spill]] %s3572_s5 }
   0x4   :  { %10 = vsyncpa [#allocation7], 0 }
   0x5   :  { %12 = vsyncpa [#allocation7 + $0x1], 0 }
   0x6   :  { %13 = vsyncpa [#allocation10], 0 }
   0x7   :  { %15 = vsyncpa [#allocation10 + $0x1], 0 }
   0x8   :  { %16 = vsyncpa [#allocation13], 0 }
   0x9   :  { %18 = vsyncpa [#allocation13 + $0x1], 0 }
   0xa   :  { %19 = vsyncpa [#allocation8], 0 }
   0xb   :  { %21 = vsyncpa [#allocation8 + $0x1], 0  ;;  %s2938_s18 = smov 0   ;;  %s2940_s19 = smov 0  }
   0xc   :  { %s2942_s20 = smov 0   ;;  %s2944_s21 = smov 0  }
   0xd   :  { %s2946_s22 = smov 0   ;;  %s2948_s23 = smov 0  }
   0xe   :  { %s2950_s24 = smov 0   ;;  %s2952_s25 = smov 0  }
   0xf   :  { %s2954_s26 = smov 0   ;;  %s2956_s27 = smov 0  }
  0x10   :  { %s2958_s28 = smov 0  }
  0x11 LB: > { %3612 = sst [smem:[#allocation20_spill]] %s2857_s19  ;;  %s49_s29 = sadd.s32 1, %s2885_s26  ;;  %s2893_s28 = sphi %s2958_s28, %s27_s28   ;;  %s2889_s27 = sphi %s2956_s27, %s3682_s27   ;;  %s2885_s26 = sphi %s2954_s26, %s3681_s26   ;;  %s2881_s25 = sphi %s2952_s25, %s3680_s25   ;;  %s2877_s24 = sphi %s2950_s24, %s3679_s24   ;;  %s2873_s23 = sphi %s2948_s23, %s3674_s23   ;;  %s2869_s22 = sphi %s2946_s22, %s3678_s22   ;;  %s2865_s21 = sphi %s2944_s21, %s3677_s21   ;;  %s2861_s20 = sphi %s2942_s20, %s3672_s20   ;;  %s2857_s19 = sphi %s2940_s19, %s3671_s19   ;;  %s2853_s18 = sphi %s2938_s18, %s3670_s18  }
  0x12   : > { %3613 = sst [smem:[#allocation21_spill]] %s2861_s20  ;;  %p2995_p0 = scmp.ge.s32.totalorder %s49_s29, 2 }
  0x13   : > { %3614 = sst [smem:[#allocation22_spill]] %s2865_s21  ;;  %p3578_p1 = scmp.ne.s32.totalorder %s2873_s23, %s2869_s22 }
  0x14   : > { %3615 = sst [smem:[#allocation23_spill]] %s2873_s23  ;;  %p3579_p2 = scmp.eq.s32.totalorder %s2893_s28, 0 }
  0x15   : > { %3616 = sst [smem:[#allocation24_spill]] %s2877_s24  ;;  %s3684_s29 = smov (%p2995_p0, %s49_s29), 0 }
  0x16   : > { %3617 = sst [smem:[#allocation25_spill]] %s2881_s25  ;;  %p73_p3 = por %p3579_p2, %p3578_p1 }
  0x17   : > { %3618 = sst [smem:[#allocation26_spill]] %s2893_s28  ;;  %p3576_p4 = scmp.lt.s32.totalorder %s2893_s28, 4 }
  0x18   : > { %s3619_s6 = scalar_select %p2995_p0, 1, 0 }
  0x19   : > { %3620 = sst [smem:[#allocation27_spill]] %s3684_s29  ;;  %s3015_s8 = sand.u32 1, %s2873_s23  }
  0x1a   : > { %p3019_p5 = pnand %p3576_p4, %p73_p3  ;;  %s3577_s10 = sand.u32 1, %s2893_s28  }
  0x1b   : > { %s3574_s11 = sshll.u32 %s3015_s8, 4  ;;  %s2146_s12 = sshll.u32 %s2885_s26, 1 }
  0x1c   : > { %s3621_s9 = scalar_select %p3019_p5, 1, 0 }
  0x1d   : > { %s2147_s13 = sshll.u32 %s2889_s27, 2  ;;  %s277_s15 = scalar_lea.vmem [#allocation9], %s3574_s11 }
  0x1e   : > { %s3027_s14 = sadd.s32 %s2147_s13, %s2146_s12  ;;  %s288_s16 = sshll.u32 %s277_s15, 4  ;;  %s3032_s16 = int_to_ptr.vmem [resolvable:$true] %s288_s16 }
  0x1f   : > { %s3575_s17 = sshll.u32 %s3027_s14, 7  ;;  %s3622_s1 = sld [smem:[#allocation35_spill]] }
  0x20   : > { %s3043_s12 = scalar_lea.sflag [#allocation10], %s3577_s10  ;;  %p3049_p7 = pneg %p3019_p5 }
  0x25   : > { %s3039_s5 = scalar_lea.hbm %s3622_s1, %s3575_s17  ;;  %s2618_s11 = scalar_lea.hbm %s3622_s1, 1024 }
  0x26   : > { %s2613_s13 = scalar_lea.hbm %s3039_s5, 256  ;;  %p2619_p10 = scmp.lt.u32.totalorder %s3039_s5, %s3622_s1 }
  0x27   : > { %p2614_p6 = scmp.ne.s32.totalorder %s3039_s5, %s2613_s13  ;;  %p2620_p11 = scmp.lt.u32.totalorder %s2618_s11, %s2613_s13 }
  0x28   : > { %p2622_p13 = scmp.lt.u32.totalorder %s2613_s13, %s3039_s5 }
  0x29   : > { %p2616_p8 = pnand %p3049_p7, %p2614_p6  ;;  %p2621_p12 = por %p2620_p11, %p2619_p10 }
  0x2b   : > { %p2617_p9 = pneg %p2616_p8  ;;  %p2623_p3 = por %p2622_p13, %p2621_p12 }
  0x2d   : > { %p2624_p4 = pnand %p2623_p3, %p2617_p9 }
  0x2f   : > { %2627 = shalt.err (!%p2624_p4)
}
  0x30   : > { %s2628_s10 = scalar_lea.vmem %s3032_s16, 256  ;;  %s2895_s30 = smov [#allocation9]  }
  0x31   : > { %p2629_p6 = scmp.ne.s32.totalorder %s3032_s16, %s2628_s10  ;;  %s2633_s7 = sshll.u32 %s2895_s30, 4  ;;  %s2634_s7 = int_to_ptr.vmem [resolvable:$false] %s2633_s7 }
  0x32   : > { %s2635_s25 = scalar_lea.vmem %s2634_s7, 512  ;;  %p2636_p2 = scmp.lt.s32.totalorder %s3032_s16, %s2634_s7 }
  0x33   : > { %p2631_p8 = pnand %p2629_p6, %p3049_p7  ;;  %p2637_p0 = scmp.lt.s32.totalorder %s2635_s25, %s2628_s10 }
  0x35   : > { %p2632_p1 = pneg %p2631_p8  ;;  %p2638_p10 = por %p2637_p0, %p2636_p2 }
  0x37   : > { %p2639_p11 = pnand %p2638_p10, %p2632_p1 }
  0x39   : > { %2642 = shalt.err (!%p2639_p11)
}
  0x3a   : > { %s3581_s11 = smov 128   ;;  %s3583_s10 = smov 8  }
  0x3b   : > { %2476 = dma.hbm_to_vmem [thread:$0]  (!%p3019_p5), %s3039_s5, 256, %s3032_s16, %s3043_s12, %s3581_s11, %s3581_s11, %s3583_s10  }
  0x3c   : > { %s3624_s17 = sshll.u32 %s3027_s14, 7  ;;  %s3625_s25 = sshll.u32 %s3015_s8, 4 }
  0x3d   : > { %s3081_s7 = scalar_lea.hbm %s3569_s2, %s3624_s17  ;;  %s302_s1 = scalar_lea.vmem [#allocation11], %s3625_s25 }
  0x3e   : > { %s313_s24 = sshll.u32 %s302_s1, 4  ;;  %p2157_p0 = scmp.ge.s32.totalorder %s2893_s28, 1  ;;  %s3085_s24 = int_to_ptr.vmem [resolvable:$true] %s313_s24 }
  0x3f   : > { %p362_p1 = scmp.lt.s32.totalorder %s2893_s28, 5  ;;  %s3094_s14 = sadd.s32 4294967295, %s2893_s28  }
  0x40   : > { %s2137_s16 = sadd.s32 4294967294, %s2893_s28   ;;  %s53_s17 = sadd.s32 1, %s2889_s27 }
  0x41   : > { %p3089_p2 = pnand %p2157_p0, %p362_p1  ;;  %p3585_p4 = scmp.ne.s32.totalorder %s2869_s22, %s2865_s21 }
  0x42   : > { %p3628_p9 = scmp.ne.s32.totalorder %s3619_s6, 0  ;;  %p78_p12 = scmp.eq.s32.totalorder %s3094_s14, 0 }
  0x43   : > { %s3626_s5 = scalar_select %p3089_p2, 1, 0 }
  0x44   : > { %s3686_s17 = smov (!%p3628_p9, %s53_s17), %s2889_s27  ;;  %s152_s1 = sadd.s32 1, %s2861_s20 }
  0x45   : > { %3627 = sst [smem:[#allocation28_spill]] %s3626_s5  ;;  %p55_p13 = scmp.ge.s32.totalorder %s3686_s17, 2 }
  0x46   : > { %p159_p3 = scmp.ne.s32.totalorder %s2861_s20, %s2857_s19  ;;  %p3110_p6 = por %p78_p12, %p3585_p4 }
  0x47   : > { %p165_p8 = scmp.ne.s32.totalorder %s2857_s19, %s2853_s18  ;;  %s3688_s17 = smov (%p55_p13, %s3686_s17), 0 }
  0x48   : > { %s3629_s13 = scalar_select %p3110_p6, 1, 0 }
  0x49   : > { %3631 = sst [smem:[#allocation30_spill]] %s3688_s17  ;;  %p3632_p10 = scmp.eq.s32.totalorder %s2893_s28, 0 }
  0x4a   : > { %3630 = sst [smem:[#allocation29_spill]] %s3629_s13  ;;  %p3124_p0 = por %p165_p8, %p78_p12 }
  0x4b   : > { %p3120_p11 = por %p159_p3, %p3632_p10  ;;  %s57_s25 = ssub.s32 %s2889_s27, %s3688_s17 }
  0x4c   : > { %s3634_s30 = scalar_select %p3124_p0, 1, 0 }
  0x4d   : > { %p221_p1 = scmp.eq.s32.totalorder %s3094_s14, 3  ;;  %s3636_s11 = ssub.s32 %s2885_s26, %s3684_s29 }
  0x4e   : > { %3635 = sst [smem:[#allocation31_spill]] %s3634_s30  ;;  %s59_s10 = sor.u32 %s3636_s11, %s57_s25 }
  0x4f   : > { %p150_p9 = scmp.eq.s32.totalorder %s57_s25, 0  ;;  %p62_p13 = scmp.eq.s32.totalorder %s59_s10, 0 }
  0x50   : > { %p3637_p4 = scmp.ne.s32.totalorder %s2873_s23, %s2869_s22  ;;  %s3640_s13 = sadd.s32 1, %s2873_s23 }
  0x51   : > { %s3142_s19 = scalar_select %p150_p9, %s2861_s20, %s152_s1  }
  0x52   : > { %p3137_p6 = por %p221_p1, %p3637_p4  ;;  %p227_p12 = scmp.eq.s32.totalorder %s2137_s16, 3 }
  0x53   : > { %3639 = sst [smem:[#allocation32_spill]] %s3142_s19  ;;  %s325_s17 = sand.u32 1, %s2861_s20  }
  0x54   : > { %s3638_s18 = scalar_select %p3137_p6, 1, 0 }
  0x55   : > { %s3147_s5 = scalar_select %p62_p13, %s2873_s23, %s3640_s13  }
  0x56   : > { %s2153_s30 = sshll.u32 %s2889_s27, 4  ;;  %p3642_p3 = scmp.ne.s32.totalorder %s2869_s22, %s2865_s21 }
  0x57   : > { %3641 = sst [smem:[#allocation33_spill]] %s3147_s5  ;;  %s326_s1 = scalar_lea.vmem [#allocation12], %s325_s17 }
  0x58   : > { %p3154_p8 = por %p227_p12, %p3642_p3  ;;  %s3645_s3 = sld [smem:[#allocation36_spill]] }
  0x59   : > { %s334_s13 = sshll.u32 %s326_s1, 4  ;;  %p3646_p4 = scmp.lt.s32.totalorder %s2893_s28, 4  ;;  %s3163_s13 = int_to_ptr.vmem [resolvable:$true] %s334_s13 }
  0x5a   : > { %s3643_s29 = scalar_select %p3154_p8, 1, 0 }
  0x5b   : > { %p3169_p10 = pnand %p3646_p4, %p3120_p11  ;;  %s3173_s5 = sshll.u32 %s325_s17, 4 }
  0x5c   : > { %3644 = sst [smem:[#allocation34_spill]] %s3643_s29 }
  0x5d   : > { %s3647_s16 = scalar_select %p3169_p10, 1, 0 }
  0x5e   : > { %s3161_s25 = scalar_lea.hbm %s3645_s3, %s2153_s30  ;;  %s3648_s30 = sand.u32 1, %s2893_s28  }
  0x5f   : > { %s3177_s11 = scalar_lea.sflag [#allocation13], %s3648_s30  ;;  %s2643_s10 = scalar_lea.hbm %s3161_s25, 16 }
  0x60   : > { %p2644_p1 = scmp.ne.s32.totalorder %s3161_s25, %s2643_s10  ;;  %p3606_p9 = pneg %p3169_p10 }
  0x61   : > { %s2648_s23 = scalar_lea.hbm %s3645_s3, 32  ;;  %p2649_p11 = scmp.lt.u32.totalorder %s3161_s25, %s3645_s3 }
  0x62   : > { %p2646_p13 = pnand %p3606_p9, %p2644_p1  ;;  %p2650_p3 = scmp.lt.u32.totalorder %s2648_s23, %s2643_s10 }
  0x63   : > { %p2652_p8 = scmp.lt.u32.totalorder %s2643_s10, %s3161_s25 }
  0x64   : > { %p2647_p12 = pneg %p2646_p13  ;;  %p2651_p4 = por %p2650_p3, %p2649_p11 }
  0x66   : > { %p2653_p6 = por %p2652_p8, %p2651_p4 }
  0x68   : > { %p2654_p0 = pnand %p2653_p6, %p2647_p12 }
  0x6a   : > { %2657 = shalt.err (!%p2654_p0)
}
  0x6b   : > { %s2658_s17 = scalar_lea.vmem %s3163_s13, 16  ;;  %s2898_s30 = smov [#allocation12]  }
  0x6c   : > { %p2659_p1 = scmp.ne.s32.totalorder %s3163_s13, %s2658_s17  ;;  %s2663_s6 = sshll.u32 %s2898_s30, 4  ;;  %s2664_s6 = int_to_ptr.vmem [resolvable:$false] %s2663_s6 }
  0x6d   : > { %s2665_s19 = scalar_lea.vmem %s2664_s6, 32  ;;  %p2666_p5 = scmp.lt.s32.totalorder %s3163_s13, %s2664_s6 }
  0x6e   : > { %p2661_p13 = pnand %p2659_p1, %p3606_p9  ;;  %p2667_p11 = scmp.lt.s32.totalorder %s2665_s19, %s2658_s17 }
  0x70   : > { %p2662_p2 = pneg %p2661_p13  ;;  %p2668_p3 = por %p2667_p11, %p2666_p5 }
  0x72   : > { %p2669_p8 = pnand %p2668_p3, %p2662_p2 }
  0x74   : > { %2672 = shalt.err (!%p2669_p8)
}
  0x75   : > { %2482 = dma.hbm_to_vmem [thread:$0]  (!%p3169_p10), %s3161_s25, 16, %s3163_s13, %s3177_s11  }
  0x76   : > { %s345_s20 = scalar_lea.vmem [#allocation14], %s3173_s5  ;;  %s2140_s10 = sshll.u32 %s3015_s8, 5 }
  0x77   : > { %s354_s23 = sshll.u32 %s345_s20, 4  ;;  %s2171_s1 = sshll.u32 %s2885_s26, 2  ;;  %s3206_s23 = int_to_ptr.vmem [resolvable:$true] %s354_s23 }
  0x78   : > { %s2143_s17 = sshll.u32 %s2889_s27, 3  ;;  %s251_s6 = scalar_lea.vmem [#allocation6], %s2140_s10 }
  0x79   : > { %s260_s30 = sadd.s32 %s2171_s1, %s2143_s17  ;;  %s263_s19 = sshll.u32 %s251_s6, 4  ;;  %s3211_s19 = int_to_ptr.vmem [resolvable:$true] %s263_s19 }
  0x7a   : > { %s2144_s3 = sshll.u32 %s260_s30, 7  ;;  %s2172_s5 = sshll.u32 %s2889_s27, 8 }
  0x7b   : > { %s3216_s28 = scalar_lea.hbm %s3567_s0, %s2144_s3  ;;  %s248_s25 = scalar_lea.sflag [#allocation7], %s3015_s8 }
  0x7c   : > { %s2673_s13 = scalar_lea.hbm %s3216_s28, 512  ;;  %s2678_s1 = scalar_lea.hbm %s3567_s0, 2048 }
  0x7d   : > { %p2674_p5 = scmp.ne.s32.totalorder %s3216_s28, %s2673_s13  ;;  %p2679_p0 = scmp.lt.u32.totalorder %s3216_s28, %s3567_s0 }
  0x7e   : > { %p2680_p12 = scmp.lt.u32.totalorder %s2678_s1, %s2673_s13  ;;  %p2682_p1 = scmp.lt.u32.totalorder %s2673_s13, %s3216_s28 }
  0x7f   : > { %p2676_p2 = pnand %p2674_p5, %p3049_p7 }
  0x80   : > { %p2681_p4 = por %p2680_p12, %p2679_p0 }
  0x81   : > { %p2677_p6 = pneg %p2676_p2 }
  0x82   : > { %p2683_p13 = por %p2682_p1, %p2681_p4 }
  0x84   : > { %p2684_p11 = pnand %p2683_p13, %p2677_p6 }
  0x86   : > { %2687 = shalt.err (!%p2684_p11)
}
  0x87   : > { %s2688_s3 = scalar_lea.vmem %s3211_s19, 512  ;;  %s2899_s21 = smov [#allocation6]  }
  0x88   : > { %p2689_p3 = scmp.ne.s32.totalorder %s3211_s19, %s2688_s3  ;;  %s2693_s29 = sshll.u32 %s2899_s21, 4  ;;  %s2694_s29 = int_to_ptr.vmem [resolvable:$false] %s2693_s29 }
  0x89   : > { %s2695_s6 = scalar_lea.vmem %s2694_s29, 1024  ;;  %p2696_p2 = scmp.lt.s32.totalorder %s3211_s19, %s2694_s29 }
  0x8a   : > { %p2691_p8 = pnand %p2689_p3, %p3049_p7  ;;  %p2697_p9 = scmp.lt.s32.totalorder %s2695_s6, %s2688_s3 }
  0x8c   : > { %p2692_p5 = pneg %p2691_p8  ;;  %p2698_p0 = por %p2697_p9, %p2696_p2 }
  0x8e   : > { %p2699_p12 = pnand %p2698_p0, %p2692_p5 }
  0x90   : > { %2702 = shalt.err (!%p2699_p12)
}
  0x91   : > { %p3649_p6 = scmp.ne.s32.totalorder %s3621_s9, 0  ;;  %s3650_s13 = smov 8  }
  0x92   : > { %s3651_s20 = smov 128   ;;  %s2703_s10 = scalar_lea.hbm %s3081_s7, 256 }
  0x93   : > { %2473 = dma.hbm_to_vmem [thread:$0]  (!%p3649_p6), %s3216_s28, 512, %s3211_s19, %s248_s25, %s3651_s20, %s3651_s20, %s3650_s13  }
  0x94   : > { %p2704_p4 = scmp.ne.s32.totalorder %s3081_s7, %s2703_s10  ;;  %s2708_s30 = scalar_lea.hbm %s3569_s2, 1024 }
  0x95   : > { %p2709_p13 = scmp.lt.u32.totalorder %s3081_s7, %s3569_s2  ;;  %p2710_p11 = scmp.lt.u32.totalorder %s2708_s30, %s2703_s10 }
  0x96   : > { %p2706_p9 = pnand %p2704_p4, %p3049_p7  ;;  %p2712_p8 = scmp.lt.u32.totalorder %s2703_s10, %s3081_s7 }
  0x97   : > { %p2711_p3 = por %p2710_p11, %p2709_p13 }
  0x98   : > { %p2707_p1 = pneg %p2706_p9 }
  0x99   : > { %p2713_p5 = por %p2712_p8, %p2711_p3 }
  0x9b   : > { %p2714_p2 = pnand %p2713_p5, %p2707_p1 }
  0x9d   : > { %2717 = shalt.err (!%p2714_p2)
}
  0x9e   : > { %s2718_s28 = scalar_lea.vmem %s3085_s24, 256  ;;  %s2900_s8 = smov [#allocation11]  }
  0x9f   : > { %p2719_p0 = scmp.ne.s32.totalorder %s3085_s24, %s2718_s28  ;;  %s2723_s19 = sshll.u32 %s2900_s8, 4  ;;  %s2724_s19 = int_to_ptr.vmem [resolvable:$false] %s2723_s19 }
  0xa0   : > { %s2725_s25 = scalar_lea.vmem %s2724_s19, 512  ;;  %p2726_p9 = scmp.lt.s32.totalorder %s3085_s24, %s2724_s19 }
  0xa1   : > { %p2721_p12 = pnand %p2719_p0, %p3049_p7  ;;  %p2727_p10 = scmp.lt.s32.totalorder %s2725_s25, %s2718_s28 }
  0xa3   : > { %p2722_p4 = pneg %p2721_p12  ;;  %p2728_p13 = por %p2727_p10, %p2726_p9 }
  0xa5   : > { %p2729_p11 = pnand %p2728_p13, %p2722_p4 }
  0xa7   : > { %2732 = shalt.err (!%p2729_p11)
}
  0xa8   : > { %2479 = dma.hbm_to_vmem [thread:$0]  (!%p3649_p6), %s3081_s7, 256, %s3085_s24, %s3043_s12, %s3651_s20, %s3651_s20, %s3650_s13  }
  0xa9   : > { %s3276_s6 = scalar_lea.hbm %s3571_s4, %s2172_s5  ;;  %p3652_p10 = scmp.ne.s32.totalorder %s3647_s16, 0 }
  0xaa   : > { %s2733_s9 = scalar_lea.hbm %s3276_s6, 256  ;;  %s2738_s24 = scalar_lea.hbm %s3571_s4, 512 }
  0xab   : > { %p2734_p7 = scmp.ne.s32.totalorder %s3276_s6, %s2733_s9  ;;  %p3653_p1 = pneg %p3652_p10 }
  0xac   : > { %p2739_p6 = scmp.lt.u32.totalorder %s3276_s6, %s3571_s4  ;;  %p2740_p5 = scmp.lt.u32.totalorder %s2738_s24, %s2733_s9 }
  0xad   : > { %p2736_p3 = pnand %p2734_p7, %p3653_p1  ;;  %p2742_p0 = scmp.lt.u32.totalorder %s2733_s9, %s3276_s6 }
  0xae   : > { %p2741_p2 = por %p2740_p5, %p2739_p6 }
  0xaf   : > { %p2737_p8 = pneg %p2736_p3 }
  0xb0   : > { %p2743_p12 = por %p2742_p0, %p2741_p2 }
  0xb2   : > { %p2744_p4 = pnand %p2743_p12, %p2737_p8 }
  0xb4   : > { %2747 = shalt.err (!%p2744_p4)
}
  0xb5   : > { %s2748_s5 = scalar_lea.vmem %s3206_s23, 256  ;;  %p3654_p13 = pmov %p3653_p1 }
  0xb6   : > { %p2749_p9 = scmp.ne.s32.totalorder %s3206_s23, %s2748_s5  ;;  %s2901_s17 = smov [#allocation14]  }
  0xb7   : > { %s2753_s30 = sshll.u32 %s2901_s17, 4  ;;  %s2754_s30 = int_to_ptr.vmem [resolvable:$false] %s2753_s30 }
  0xb8   : > { %p2751_p11 = pnand %p2749_p9, %p3654_p13  ;;  %s2755_s3 = scalar_lea.vmem %s2754_s30, 512 }
  0xb9   : > { %p2756_p1 = scmp.lt.s32.totalorder %s3206_s23, %s2754_s30  ;;  %p2757_p3 = scmp.lt.s32.totalorder %s2755_s3, %s2748_s5 }
  0xba   : > { %p2752_p7 = pneg %p2751_p11 }
  0xbb   : > { %p2758_p6 = por %p2757_p3, %p2756_p1 }
  0xbd   : > { %p2759_p5 = pnand %p2758_p6, %p2752_p7 }
  0xbf   : > { %2762 = shalt.err (!%p2759_p5)
}
  0xc0   : > { %2485 = dma.hbm_to_vmem [thread:$0]  (!%p3652_p10), %s3276_s6, 256, %s3206_s23, %s3177_s11, %s3651_s20, %s3651_s20, %s3650_s13  }
  0xc1   : > { %s3655_s21 = sld [smem:[#allocation28_spill]] }
  0xc7   : > { %p3656_p8 = scmp.ne.s32.totalorder %s3655_s21, 0 }
  0xc8   : > { %s3657_s28 = sld [smem:[#allocation29_spill]] (!%p3656_p8)  ;;  %s3308_s8 = sand.u32 (!%p3656_p8), 1, %s2869_s22  }
  0xc9   : > { %366 = sbr.rel (%p3656_p8) target bundleno = 1114 (0x45a), region = 40  ;;  %s2158_s19 = sshll.u32 (!%p3656_p8), %s3308_s8, 5 }
  0xca   : > { %s369_s25 = scalar_lea.sflag (!%p3656_p8), [#allocation7], %s3308_s8  ;;  %s372_s16 = scalar_lea.vmem (!%p3656_p8), [#allocation6], %s2158_s19 }
  0xce   : > { %p3658_p2 = scmp.ne.s32.totalorder (!%p3656_p8), %s3657_s28, 0 }
  0xd0   : > { %2836 = dma.done.wait (%p3658_p2), %s369_s25, 512  }
  0xd1   : > { %2838 = vsyncadd (%p3658_p2), %s369_s25, 4294966784  ;;  %s377_s11 = sand.u32 1, %s3094_s14   ;;  %s2159_s23 = sshll.u32 %s3308_s8, 4 }
  0xd2   : > { %s378_s13 = scalar_lea.sflag [#allocation10], %s377_s11  ;;  %s381_s20 = scalar_lea.vmem [#allocation9], %s2159_s23 }
  0xd3   : > { %2840 = dma.done.wait (%p3658_p2), %s378_s13, 512  }
  0xd4   : > { %2842 = vsyncadd (%p3658_p2), %s378_s13, 4294966784  ;;  %s3659_s15 = sld [smem:[#allocation20_spill]]  ;;  %s3660_s29 = sld [smem:[#allocation31_spill]] }
  0xd5   : > { %s3325_s9 = scalar_lea.vmem [#allocation11], %s2159_s23  ;;  %s396_s10 = scalar_lea.sflag [#allocation13], %s377_s11 }
  0xda   : > { %s397_s6 = sand.u32 1, %s3659_s15   ;;  %p3661_p10 = scmp.ne.s32.totalorder %s3660_s29, 0 }
  0xdb   : > { %s3329_s1 = scalar_lea.vmem [#allocation12], %s397_s6 }
  0xdc   : > { %2844 = dma.done.wait (%p3661_p10), %s396_s10, 272  }
  0xdd   : > { %2846 = vsyncadd (%p3661_p10), %s396_s10, 4294967024  ;;  %vm471_vm0 = vcmask 261120   ;;  %v493_v0 = vld [vmem:[%s381_s20] sm:$0xff]  ;;  %v494_v1 = vld [vmem:[%s381_s20 + $0x8] sm:$0xff]  ;;  %vm476_vm1 = vcmask 7168   ;;  %vm1115_vm2 = vcmask 130048  }
  0xde   : > { %v463_v2 = vld [vmem:[%s372_s16] sm:$0xff]  ;;  %v518_v3 = vsel %vm471_vm0, %v493_v0, 0  ;;  %v521_v4 = vsel %vm471_vm0, %v494_v1, 0  ;;  %v464_v6 = vld [vmem:[%s372_s16 + $0x8] sm:$0xff]  ;;  %v465_v7 = vld [vmem:[%s372_s16 + $0x10] sm:$0xff]  ;;  %s2161_s14 = sshll.u32 %s397_s6, 4 }
  0xdf   : > { %v467_v5 = vmul.f32 0.17677669, %v463_v2  ;;  %v524_v8 = vand.u32 4294901760, %v518_v3  ;;  %v527_v9 = vand.u32 4294901760, %v521_v4  ;;  %v468_v10 = vmul.f32 0.17677669, %v464_v6 }
  0xe0   : > { %v469_v11 = vmul.f32 0.17677669, %v465_v7  ;;  %v466_v12 = vld [vmem:[%s372_s16 + $0x18] sm:$0xff]  ;;  %v2902_v54 = vmov -1e+30   ;;  %s407_s24 = scalar_lea.vmem [#allocation14], %s2161_s14 }
  0xe1   : > { %472 = vst.msk [vmem:[#allocation2] sm:$0xff] %vm471_vm0, %v467_v5  ;;  %v3338_v13 = vpack.c.bf16 %v527_v9, %v524_v8  ;;  %v632_v14 = vsub.f32 %v518_v3, %v524_v8  ;;  %v639_v15 = vsub.f32 %v521_v4, %v527_v9  ;;  %473 = vst.msk [vmem:[#allocation2 + $0x8] sm:$0xff] %vm471_vm0, %v468_v10  ;;  %v470_v16 = vmul.f32 0.17677669, %v466_v12  ;;  %v2163_v55 = vld [vmem:[%s3329_s1] ss:$0 sm:$0xff] }
  0xe2   : > { %474 = vst.msk [vmem:[#allocation2 + $0x10] sm:$0xff] %vm471_vm0, %v469_v11  ;;  %v2903_v4 = vmov 0   ;;  %v2904_v5 = vmov 0.0   ;;  %s3662_s12 = sld [smem:[#allocation24_spill]]  ;;  %s3663_s7 = sld [smem:[#allocation25_spill]] }
  0xe3   : > { %2367 = vmatprep.subr.bf16.mxu0 %v3338_v13  ;;  %v633_v17 = vand.u32 4294901760, %v632_v14  ;;  %v640_v18 = vand.u32 4294901760, %v639_v15  ;;  %475 = vst.msk [vmem:[#allocation2 + $0x18] sm:$0xff] %vm471_vm0, %v470_v16  ;;  %v2374_v51 = vpack.c.bf16 %v639_v15, %v632_v14  ;;  %2587 = vset.pattern.permute.xlu0 %v2903_v4  ;;  %485 = vst.msk [vmem:[#allocation5] sm:$0xff] %vm471_vm0, %v2904_v5  ;;  %s452_s3 = scalar_lea.vmem [#allocation15], %s2158_s19  ;;  %s3664_s16 = sld [smem:[#allocation37_spill]] }
  0xe4   : > { %2369 = vmatpush3.bf16.xpose.msra.mxu0 %v3338_v13  ;;  %477 = vst.msk [vmem:[#allocation3] sm:$0xff] %vm476_vm1, %v2902_v54  ;;  %478 = vst.msk [vmem:[#allocation3 + $0x8] sm:$0xff] %vm476_vm1, %v2902_v54  ;;  %2588 = vset.pattern.permute.xlu1 %v2903_v4  ;;  %s1939_s21 = sshll.u32 %s452_s3, 4  ;;  %s1921_s23 = scalar_lea.sflag [#allocation8], %s3308_s8  ;;  %s3495_s21 = int_to_ptr.vmem [resolvable:$true] %s1939_s21 }
  0xe5   : > { %v634_v19 = vsub.f32 %v632_v14, %v633_v17  ;;  %v641_v20 = vsub.f32 %v639_v15, %v640_v18  ;;  %v2382_v53 = vpack.c.bf16 %v640_v18, %v633_v17  ;;  %479 = vst.msk [vmem:[#allocation3 + $0x10] sm:$0xff] %vm476_vm1, %v2902_v54  ;;  %480 = vst.msk [vmem:[#allocation3 + $0x18] sm:$0xff] %vm476_vm1, %v2902_v54  ;;  %s2763_s13 = scalar_lea.vmem %s3495_s21, 512  ;;  %p3665_p12 = scmp.ne.s32.totalorder %s3638_s18, 0 }
  0xe6   : > { %481 = vst.msk [vmem:[#allocation4] sm:$0xff] %vm476_vm1, %v2904_v5  ;;  %482 = vst.msk [vmem:[#allocation4 + $0x8] sm:$0xff] %vm476_vm1, %v2904_v5  ;;  %p2764_p0 = scmp.ne.s32.totalorder %s3495_s21, %s2763_s13  ;;  %s2905_s20 = smov [#allocation15]  }
  0xe7   : > { %v635_v22 = vand.u32 4294901760, %v634_v19  ;;  %v642_v23 = vand.u32 4294901760, %v641_v20  ;;  %483 = vst.msk [vmem:[#allocation4 + $0x10] sm:$0xff] %vm476_vm1, %v2904_v5  ;;  %484 = vst.msk [vmem:[#allocation4 + $0x18] sm:$0xff] %vm476_vm1, %v2904_v5  ;;  %s2767_s15 = sshll.u32 %s2905_s20, 4  ;;  %s2768_s15 = int_to_ptr.vmem [resolvable:$false] %s2767_s15 }
  0xe8   : > { %v489_v21 = vld [vmem:[#allocation2] sm:$0xff]  ;;  %v490_v25 = vld [vmem:[#allocation2 + $0x8] sm:$0xff]  ;;  %486 = vst.msk [vmem:[#allocation5 + $0x8] sm:$0xff] %vm471_vm0, %v2904_v5  ;;  %487 = vst.msk [vmem:[#allocation5 + $0x10] sm:$0xff] %vm471_vm0, %v2904_v5  ;;  %s2173_s5 = sshll.u32 %s3662_s12, 2  ;;  %s2167_s17 = sshll.u32 %s3663_s7, 3 }
  0xe9   : > { %v506_v24 = vsel %vm471_vm0, %v489_v21, 0  ;;  %v491_v26 = vld [vmem:[#allocation2 + $0x10] sm:$0xff]  ;;  %v2370_v28 = vpack.c.bf16 %v642_v23, %v635_v22  ;;  %v509_v29 = vsel %vm471_vm0, %v490_v25, 0  ;;  %488 = vst.msk [vmem:[#allocation5 + $0x18] sm:$0xff] %vm471_vm0, %v2904_v5  ;;  %v496_v23 = vld [vmem:[%s3325_s9 + $0x8] sm:$0xff]  ;;  %s1936_s30 = sadd.s32 %s2173_s5, %s2167_s17  ;;  %p2765_p4 = pnand %p2764_p0, %p3665_p12 }
  0xea   : > { %v590_v27 = vand.u32 4294901760, %v506_v24  ;;  %v512_v30 = vsel %vm471_vm0, %v491_v26, 0  ;;  %v600_v31 = vand.u32 4294901760, %v509_v29  ;;  %v492_v33 = vld [vmem:[#allocation2 + $0x18] sm:$0xff]  ;;  %v495_v22 = vld [vmem:[%s3325_s9] sm:$0xff]  ;;  %v1249_v25 = vand.u32 4294901760, %v496_v23  ;;  %p2770_p13 = scmp.lt.s32.totalorder %s3495_s21, %s2768_s15 }
  0xeb   : > { %v610_v32 = vand.u32 4294901760, %v512_v30  ;;  %2371 = vmatprep.subr.bf16.mxu0 %v2370_v28  ;;  %v515_v35 = vsel %vm471_vm0, %v492_v33, 0  ;;  %v3382_v6 = vld [vmem:[#allocation3] sm:$0xff]  ;;  %v3389_v10 = vld [vmem:[#allocation3 + $0x8] sm:$0xff]  ;;  %s2168_s28 = sshll.u32 %s1936_s30, 7  ;;  %p2766_p9 = pneg %p2765_p4 }
  0xec   : > { %v591_v34 = vsub.f32 %v506_v24, %v590_v27  ;;  %v601_v36 = vsub.f32 %v509_v29, %v600_v31  ;;  %v620_v38 = vand.u32 4294901760, %v515_v35  ;;  %v3387_v9 = vld [vmem:[#allocation3 + $0x10] sm:$0xff]  ;;  %v3402_v16 = vld [vmem:[#allocation3 + $0x18] sm:$0xff]  ;;  %v1246_v24 = vand.u32 4294901760, %v495_v22  ;;  %s3502_s11 = scalar_lea.hbm %s3664_s16, %s2168_s28  ;;  %s2769_s29 = scalar_lea.vmem %s2768_s15, 1024 }
  0xed   : > { %v611_v37 = vsub.f32 %v512_v30, %v610_v32  ;;  %p2771_p11 = scmp.lt.s32.totalorder %s2769_s29, %s2763_s13 }
  0xee   : > { %v592_v39 = vand.u32 4294901760, %v591_v34  ;;  %v602_v40 = vand.u32 4294901760, %v601_v36  ;;  %v621_v42 = vsub.f32 %v515_v35, %v620_v38  ;;  %v3424_v26 = vpack.c.bf16 %v1249_v25, %v1246_v24 }
  0xef   : > { %v612_v41 = vand.u32 4294901760, %v611_v37  ;;  %p2772_p7 = por %p2771_p11, %p2770_p13 }
  0xf0   : > { %v593_v43 = vsub.f32 %v591_v34, %v592_v39  ;;  %v603_v44 = vsub.f32 %v601_v36, %v602_v40  ;;  %v622_v46 = vand.u32 4294901760, %v621_v42  ;;  %2391 = vmatprep.subr.bf16.mxu1 %v3424_v26 }
  0xf1   : > { %v613_v45 = vsub.f32 %v611_v37, %v612_v41  ;;  %2393 = vmatpush3.bf16.msra.mxu1 %v3424_v26  ;;  %p2773_p1 = pnand %p2772_p7, %p2766_p9 }
  0xf2   : > { %v594_v47 = vand.u32 4294901760, %v593_v43  ;;  %v604_v48 = vand.u32 4294901760, %v603_v44  ;;  %v623_v50 = vsub.f32 %v621_v42, %v622_v46 }
  0xf3   : > { %v614_v49 = vand.u32 4294901760, %v613_v45 }
  0xf4   : > { %2250 = vmatprep.mubr.f32.mxu0 %v594_v47  ;;  %v624_v52 = vand.u32 4294901760, %v623_v50 }
  0xf5   : > { %2251 = vmatmul.mubr.f32.vlgmr.msra.gmra.mrb[0].mxu0 %v604_v48 }
  0xf6   : > { %2373 = vmatpush3.bf16.xpose.msra.mxu0 %v2370_v28  ;;  %2253 = vmatprep.mubr.f32.mxu0 %v614_v49  ;;  %v1361_v28 = vsub.f32 %v496_v23, %v1249_v25 }
  0xf7   : > { %2375 = vmatprep.subr.bf16.mxu0 %v2374_v51 }
  0xf8   : > { %v1362_v30 = vand.u32 4294901760, %v1361_v28 }
  0xf9   : > { %2254 = vmatmul.mubr.f32.gmra.mrb[2].mxu0 %v624_v52 }
  0xfa   : > { %2260 = vmatprep.mubr.f32.mxu0 %v590_v27 }
  0xfd   : > { %2261 = vmatmul.mubr.f32.vlgmr.msra.gmra.mrb[0].mxu0 %v600_v31 }
  0xfe   : > { %2377 = vmatpush3.bf16.xpose.msra.mxu0 %v2374_v51  ;;  %2263 = vmatprep.mubr.f32.mxu0 %v610_v32 }
  0xff   : > { %2379 = vmatprep.subr.bf16.mxu0 %v3338_v13 }
 0x101   : > { %2264 = vmatmul.mubr.f32.gmra.mrb[2].mxu0 %v620_v38 }
 0x102   : > { %2270 = vmatprep.mubr.f32.mxu0 %v591_v34 }
 0x105   : > { %2271 = vmatmul.mubr.f32.vlgmr.msra.gmra.mrb[0].mxu0 %v601_v36 }
 0x106   : > { %2381 = vmatpush3.bf16.xpose.msra.mxu0 %v3338_v13  ;;  %2273 = vmatprep.mubr.f32.mxu0 %v611_v37 }
 0x107   : > { %2383 = vmatprep.subr.bf16.mxu0 %v2382_v53 }
 0x109   : > { %2274 = vmatmul.mubr.f32.gmra.mrb[2].mxu0 %v621_v42 }
 0x10a   : > { %2280 = vmatprep.mubr.f32.mxu0 %v592_v39 }
 0x10d   : > { %2281 = vmatmul.mubr.f32.vlgmr.msra.gmra.mrb[0].mxu0 %v602_v40 }
 0x10e   : > { %2385 = vmatpush3.bf16.xpose.msra.mxu0 %v2382_v53  ;;  %2283 = vmatprep.mubr.f32.mxu0 %v612_v41 }
 0x10f   : > { %2387 = vmatprep.subr.bf16.mxu0 %v3338_v13 }
 0x111   : > { %2284 = vmatmul.mubr.f32.gmra.mrb[2].mxu0 %v622_v46 }
 0x112   : > { %2290 = vmatprep.mubr.f32.mxu0 %v590_v27 }
 0x115   : > { %2291 = vmatmul.mubr.f32.vlgmr.msra.gmra.mrb[0].mxu0 %v600_v31 }
 0x116   : > { %2389 = vmatpush3.bf16.xpose.msra.mxu0 %v3338_v13  ;;  %2293 = vmatprep.mubr.f32.mxu0 %v610_v32 }
 0x119   : > { %2294 = vmatmul.mubr.f32.gmra.mrb[2].mxu0 %v620_v38 }
 0x11a   : > { %2300 = vmatprep.mubr.f32.mxu0 %v590_v27  ;;  %v1354_v27 = vsub.f32 %v495_v22, %v1246_v24 }
 0x11c   : > { %v1355_v29 = vand.u32 4294901760, %v1354_v27  ;;  %v3428_v36 = vpack.c.bf16 %v1361_v28, %v1354_v27 }
 0x11d   : > { %2301 = vmatmul.mubr.f32.vlgmr.msra.gmra.mrb[0].mxu0 %v600_v31 }
 0x11e   : > { %2303 = vmatprep.mubr.f32.mxu0 %v610_v32  ;;  %v1356_v31 = vsub.f32 %v1354_v27, %v1355_v29  ;;  %v1363_v32 = vsub.f32 %v1361_v28, %v1362_v30  ;;  %v3430_v37 = vpack.c.bf16 %v1362_v30, %v1355_v29 }
 0x120   : > { %v1357_v33 = vand.u32 4294901760, %v1356_v31  ;;  %v1364_v34 = vand.u32 4294901760, %v1363_v32 }
 0x121   : > { %2304 = vmatmul.mubr.f32.gmra.mrb[2].mxu0 %v620_v38 }
 0x122   : > { %v2394_v35 = vpack.c.bf16 %v1364_v34, %v1357_v33  ;;  %v1178_v34 = vld [vmem:[#allocation4 + $0x10] sm:$0xff] }
 0x124   : > { %2395 = vmatprep.subr.bf16.mxu1 %v2394_v35 }
 0x1f0   : > { %v2302_v56 = vpop.f32.mrb[0].mxu0 }
 0x1f1   : > { %v1089_v57 = vpop.f32.mrb[1].mxu0  ;;  %v3360_v59 = vadd.f32 %v2302_v56, %v2163_v55 }
 0x1f2   : > { %v3358_v58 = vadd.f32 %v2163_v55, %v1089_v57 }
 0x1f3   : > { %v1119_v2 = vsel %vm1115_vm2, %v3360_v59, -inf }
 0x1f4   : > { %v2305_v60 = vpop.f32.mrb[2].mxu0  ;;  %v1116_v61 = vsel %vm1115_vm2, %v3358_v58, -inf }
 0x1f5   : > { %v1101_v62 = vpop.f32.mrb[3].mxu0  ;;  %1117 = vmax.xlane.f32.xlu0 %v1116_v61  ;;  %v3366_v0 = vadd.f32 %v2305_v60, %v2163_v55 }
 0x1f6   : > { %v3364_v63 = vadd.f32 %v2163_v55, %v1101_v62 }
 0x1f7   : > { %v1125_v3 = vsel %vm1115_vm2, %v3366_v0, -inf }
 0x1f8   : > { %v1122_v1 = vsel %vm1115_vm2, %v3364_v63, -inf }
 0x1f9   : > { %1123 = vmax.xlane.f32.xlu1 %v1122_v1  ;;  %1120 = vmax.xlane.f32.xlu0 %v1119_v2 }
 0x1fd   : > { %1126 = vmax.xlane.f32.xlu1 %v1125_v3 }
 0x282   : > { %v1118_v7 = vpop.xlane.xlu0 %1117 }
 0x283   : > { %v3385_v8 = vmax.f32 %v3382_v6, %v1118_v7 }
 0x285   : > { %v1132_v11 = vsub.f32 %v3382_v6, %v3385_v8  ;;  %1841 = vst.msk [vmem:[#allocation3] sm:$0xff] %vm476_vm1, %v3385_v8  ;;  %1146 = vperm.xlu0 %2587, %v3385_v8  }
 0x286   : > { %v1124_v12 = vpop.xlane.xlu1 %1123  ;;  %v1121_v13 = vpop.xlane.xlu0 %1120 }
 0x287   : > { %v3397_v14 = vmax.f32 %v3387_v9, %v1124_v12  ;;  %v3400_v15 = vmax.f32 %v3389_v10, %v1121_v13  ;;  %v1136_v25 = vmul.f32 1.442695, %v1132_v11 }
 0x289   : > { %v1134_v17 = vsub.f32 %v3387_v9, %v3397_v14  ;;  %1843 = vst.msk [vmem:[#allocation3 + $0x10] sm:$0xff] %vm476_vm1, %v3397_v14  ;;  %v1133_v18 = vsub.f32 %v3389_v10, %v3400_v15  ;;  %1842 = vst.msk [vmem:[#allocation3 + $0x8] sm:$0xff] %vm476_vm1, %v3400_v15  ;;  %1151 = vperm.xlu1 %2588, %v3400_v15  }
 0x28a   : > { %v1127_v19 = vpop.xlane.xlu1 %1126 }
 0x28b   : > { %v3414_v20 = vmax.f32 %v3402_v16, %v1127_v19  ;;  %v1138_v12 = vmul.f32 1.442695, %v1133_v18  ;;  %v1140_v15 = vmul.f32 1.442695, %v1134_v17 }
 0x28d   : > { %v1135_v21 = vsub.f32 %v3402_v16, %v3414_v20  ;;  %1844 = vst.msk [vmem:[#allocation3 + $0x18] sm:$0xff] %vm476_vm1, %v3414_v20  ;;  %1156 = vperm.xlu1 %2588, %v3397_v14   ;;  %v1176_v16 = vld [vmem:[#allocation4] sm:$0xff] }
 0x28f   : > { %v1142_v6 = vmul.f32 1.442695, %v1135_v21  ;;  %v1177_v21 = vld [vmem:[#allocation4 + $0x8] sm:$0xff] }
 0x291   : > { %1161 = vperm.xlu1 %2588, %v3414_v20  }
 0x304   : > { %v1147_v38 = vpop.permute.xlu0 %1146 }
 0x305   : > { %v1164_v39 = vsub.f32 %v3358_v58, %v1147_v38 }
 0x307   : > { %v1168_v40 = vmul.f32 1.442695, %v1164_v39 }
 0x308   : > { %v1152_v41 = vpop.permute.xlu1 %1151 }
 0x309   : > { %2589 = vpow2.f32 %v1168_v40  ;;  %v1165_v42 = vsub.f32 %v3360_v59, %v1152_v41 }
 0x30b   : > { %v1170_v43 = vmul.f32 1.442695, %v1165_v42 }
 0x30c   : > { %v1157_v44 = vpop.permute.xlu1 %1156 }
 0x30d   : > { %2591 = vpow2.f32 %v1170_v43  ;;  %v1166_v45 = vsub.f32 %v3364_v63, %v1157_v44  ;;  %v1860_v44 = vld [vmem:[#allocation3] sm:$0xff] }
 0x30e   : > { %vm1864_vm3 = vcmp.gt.f32.partialorder %v1860_v44, -1e+29 }
 0x30f   : > { %v1172_v46 = vmul.f32 1.442695, %v1166_v45 }
 0x310   : > { %v1162_v47 = vpop.permute.xlu1 %1161 }
 0x311   : > { %2593 = vpow2.f32 %v1172_v46  ;;  %v1167_v48 = vsub.f32 %v3366_v0, %v1162_v47 }
 0x313   : > { %v2590_v49 = vpop.eup %2589  ;;  %v1174_v50 = vmul.f32 1.442695, %v1167_v48  ;;  %v1861_v48 = vld [vmem:[#allocation3 + $0x8] sm:$0xff] }
 0x314   : > { %v1184_v51 = vsel %vm1115_vm2, %v2590_v49, 0.0  ;;  %v1234_v52 = vsel %vm1115_vm2, %v2590_v49, 0  ;;  %vm1865_vm4 = vcmp.gt.f32.partialorder %v1861_v48, -1e+29 }
 0x315   : > { %2595 = vpow2.f32 %v1174_v50  ;;  %1185 = vadd.xlane.f32.xlu1 %v1184_v51  ;;  %v3438_v53 = vand.u32 4294901760, %v1234_v52 }
 0x316   : > { %2597 = vpow2.f32 %v1138_v12 }
 0x317   : > { %v2592_v54 = vpop.eup %2591  ;;  %v3441_v55 = vsub.f32 %v1234_v52, %v3438_v53  ;;  %2599 = vpow2.f32 %v1136_v25  ;;  %v1862_v52 = vld [vmem:[#allocation3 + $0x10] sm:$0xff] }
 0x318   : > { %v1187_v56 = vsel %vm1115_vm2, %v2592_v54, 0.0  ;;  %v1237_v57 = vsel %vm1115_vm2, %v2592_v54, 0  ;;  %2601 = vpow2.f32 %v1140_v15  ;;  %vm1866_vm5 = vcmp.gt.f32.partialorder %v1862_v52, -1e+29 }
 0x319   : > { %1188 = vadd.xlane.f32.xlu0 %v1187_v56  ;;  %v1314_v58 = vand.u32 4294901760, %v3441_v55  ;;  %v3446_v59 = vand.u32 4294901760, %v1237_v57  ;;  %2603 = vpow2.f32 %v1142_v6  ;;  %v1900_v56 = vld [vmem:[%s407_s24] sm:$0xff] }
 0x31b   : > { %v2594_v60 = vpop.eup %2593  ;;  %v1315_v61 = vsub.f32 %v3441_v55, %v1314_v58  ;;  %v1323_v62 = vsub.f32 %v1237_v57, %v3446_v59 }
 0x31c   : > { %v1190_v63 = vsel %vm1115_vm2, %v2594_v60, 0.0  ;;  %v1240_v0 = vsel %vm1115_vm2, %v2594_v60, 0 }
 0x31d   : > { %1191 = vadd.xlane.f32.xlu1 %v1190_v63  ;;  %v1316_v1 = vand.u32 4294901760, %v1315_v61  ;;  %v1324_v2 = vand.u32 4294901760, %v1323_v62  ;;  %v1332_v3 = vand.u32 4294901760, %v1240_v0 }
 0x31f   : > { %v2596_v4 = vpop.eup %2595  ;;  %2310 = vmatprep.mubr.f32.mxu1 %v1316_v1  ;;  %v1325_v5 = vsub.f32 %v1323_v62, %v1324_v2  ;;  %v1333_v7 = vsub.f32 %v1240_v0, %v1332_v3  ;;  %v1205_v0 = vld [vmem:[#allocation5] sm:$0xff] }
 0x320   : > { %v1193_v13 = vsel %vm1115_vm2, %v2596_v4, 0.0  ;;  %v1243_v19 = vsel %vm1115_vm2, %v2596_v4, 0  ;;  %v2598_v8 = vpop.eup %2597 }
 0x321   : > { %1194 = vadd.xlane.f32.xlu1 %v1193_v13  ;;  %v1326_v22 = vand.u32 4294901760, %v1325_v5  ;;  %v1334_v23 = vand.u32 4294901760, %v1333_v7  ;;  %v1342_v24 = vand.u32 4294901760, %v1243_v19  ;;  %v2600_v9 = vpop.eup %2599  ;;  %v1181_v32 = vmul.f32 %v2598_v8, %v1177_v21 }
 0x322   : > { %v2602_v11 = vpop.eup %2601  ;;  %v1180_v17 = vmul.f32 %v2600_v9, %v1176_v16 }
 0x323   : > { %2311 = vmatmul.mubr.f32.vlgmr.msra.gmra.mrb[0].mxu1 %v1326_v22  ;;  %v1335_v27 = vsub.f32 %v1333_v7, %v1334_v23  ;;  %v1343_v28 = vsub.f32 %v1243_v19, %v1342_v24  ;;  %v2604_v14 = vpop.eup %2603 }
 0x324   : > { %2397 = vmatpush3.bf16.msra.mxu1 %v2394_v35 }
 0x325   : > { %v1336_v29 = vand.u32 4294901760, %v1335_v27  ;;  %v1344_v10 = vand.u32 4294901760, %v1343_v28  ;;  %2399 = vmatprep.subr.bf16.mxu1 %v3428_v36 }
 0x327   : > { %2313 = vmatprep.mubr.f32.mxu1 %v1336_v29  ;;  %v1345_v18 = vsub.f32 %v1343_v28, %v1344_v10 }
 0x329   : > { %v1346_v30 = vand.u32 4294901760, %v1345_v18 }
 0x32b   : > { %2314 = vmatmul.mubr.f32.gmra.mrb[2].mxu1 %v1346_v30 }
 0x32c   : > { %2320 = vmatprep.mubr.f32.mxu1 %v3438_v53 }
 0x32f   : > { %1216 = vperm.xlu0 %2587, %v2598_v8   ;;  %2321 = vmatmul.mubr.f32.vlgmr.msra.gmra.mrb[0].mxu1 %v3446_v59 }
 0x330   : > { %2323 = vmatprep.mubr.f32.mxu1 %v1332_v3  ;;  %2401 = vmatpush3.bf16.msra.mxu1 %v3428_v36 }
 0x331   : > { %2403 = vmatprep.subr.bf16.mxu1 %v3424_v26 }
 0x332   : > { %1211 = vperm.xlu1 %2588, %v2600_v9  }
 0x333   : > { %2324 = vmatmul.mubr.f32.gmra.mrb[2].mxu1 %v1342_v24 }
 0x334   : > { %2330 = vmatprep.mubr.f32.mxu1 %v3441_v55  ;;  %v1863_v55 = vld [vmem:[#allocation3 + $0x18] sm:$0xff] }
 0x335   : > { %vm1867_vm6 = vcmp.gt.f32.partialorder %v1863_v55, -1e+29 }
 0x336   : > { %1221 = vperm.xlu1 %2588, %v2602_v11  }
 0x337   : > { %2331 = vmatmul.mubr.f32.vlgmr.msra.gmra.mrb[0].mxu1 %v1323_v62  ;;  %v1206_v62 = vld [vmem:[#allocation5 + $0x8] sm:$0xff] }
 0x338   : > { %2333 = vmatprep.mubr.f32.mxu1 %v1333_v7  ;;  %2405 = vmatpush3.bf16.msra.mxu1 %v3424_v26  ;;  %v1207_v7 = vld [vmem:[#allocation5 + $0x10] sm:$0xff] }
 0x339   : > { %2407 = vmatprep.subr.bf16.mxu1 %v3430_v37 }
 0x33a   : > { %1226 = vperm.xlu1 %2588, %v2604_v14  }
 0x33b   : > { %2334 = vmatmul.mubr.f32.gmra.mrb[2].mxu1 %v1343_v28 }
 0x33c   : > { %2340 = vmatprep.mubr.f32.mxu1 %v1314_v58 }
 0x33f   : > { %2341 = vmatmul.mubr.f32.vlgmr.msra.gmra.mrb[0].mxu1 %v1324_v2 }
 0x340   : > { %2343 = vmatprep.mubr.f32.mxu1 %v1334_v23  ;;  %2409 = vmatpush3.bf16.msra.mxu1 %v3430_v37  ;;  %v1179_v37 = vld [vmem:[#allocation4 + $0x18] sm:$0xff] }
 0x341   : > { %2411 = vmatprep.subr.bf16.mxu1 %v3424_v26  ;;  %v1183_v40 = vmul.f32 %v2604_v14, %v1179_v37 }
 0x343   : > { %2344 = vmatmul.mubr.f32.gmra.mrb[2].mxu1 %v1344_v10 }
 0x344   : > { %2350 = vmatprep.mubr.f32.mxu1 %v3438_v53 }
 0x347   : > { %2351 = vmatmul.mubr.f32.vlgmr.msra.gmra.mrb[0].mxu1 %v3446_v59 }
 0x348   : > { %2353 = vmatprep.mubr.f32.mxu1 %v1332_v3  ;;  %2413 = vmatpush3.bf16.msra.mxu1 %v3424_v26  ;;  %v1182_v26 = vmul.f32 %v2602_v11, %v1178_v34 }
 0x34b   : > { %2354 = vmatmul.mubr.f32.gmra.mrb[2].mxu1 %v1342_v24 }
 0x34c   : > { %2360 = vmatprep.mubr.f32.mxu1 %v3438_v53 }
 0x34f   : > { %2361 = vmatmul.mubr.f32.vlgmr.msra.gmra.mrb[0].mxu1 %v3446_v59  ;;  %v1901_v59 = vld [vmem:[%s407_s24 + $0x8] sm:$0xff] }
 0x350   : > { %2363 = vmatprep.mubr.f32.mxu1 %v1332_v3  ;;  %v1208_v3 = vld [vmem:[#allocation5 + $0x18] sm:$0xff] }
 0x353   : > { %2364 = vmatmul.mubr.f32.gmra.mrb[2].mxu1 %v1342_v24 }
 0x3a2   : > { %v1186_v20 = vpop.xlane.xlu1 %1185 }
 0x3a3   : > { %v1196_v31 = vadd.f32 %v1186_v20, %v1180_v17 }
 0x3a5   : > { %1201 = vst.msk [vmem:[#allocation4] sm:$0xff] %vm476_vm1, %v1196_v31 }
 0x3a6   : > { %v1189_v33 = vpop.xlane.xlu0 %1188 }
 0x3a7   : > { %v1197_v35 = vadd.f32 %v1189_v33, %v1181_v32 }
 0x3a9   : > { %1202 = vst.msk [vmem:[#allocation4 + $0x8] sm:$0xff] %vm476_vm1, %v1197_v35 }
 0x3aa   : > { %v1192_v36 = vpop.xlane.xlu1 %1191 }
 0x3ab   : > { %v1198_v38 = vadd.f32 %v1192_v36, %v1182_v26 }
 0x3ac   : > { %v1848_v39 = vld [vmem:[#allocation4] sm:$0xff] }
 0x3ad   : > { %1203 = vst.msk [vmem:[#allocation4 + $0x10] sm:$0xff] %vm476_vm1, %v1198_v38  ;;  %2605 = vrcp.f32 %v1848_v39 }
 0x3ae   : > { %v1195_v41 = vpop.xlane.xlu1 %1194  ;;  %v1217_v63 = vpop.permute.xlu0 %1216 }
 0x3af   : > { %v1199_v42 = vadd.f32 %v1195_v41, %v1183_v40  ;;  %v1230_v1 = vmul.f32 %v1217_v63, %v1206_v62 }
 0x3b0   : > { %v1849_v43 = vld [vmem:[#allocation4 + $0x8] sm:$0xff] }
 0x3b1   : > { %1204 = vst.msk [vmem:[#allocation4 + $0x18] sm:$0xff] %vm476_vm1, %v1199_v42  ;;  %2607 = vrcp.f32 %v1849_v43 }
 0x3b2   : > { %v1212_v60 = vpop.permute.xlu1 %1211 }
 0x3b3   : > { %v1229_v2 = vmul.f32 %v1212_v60, %v1205_v0 }
 0x3b4   : > { %v1850_v45 = vld [vmem:[#allocation4 + $0x10] sm:$0xff] }
 0x3b5   : > { %2609 = vrcp.f32 %v1850_v45 }
 0x3b6   : > { %v1222_v61 = vpop.permute.xlu1 %1221 }
 0x3b7   : > { %v2606_v46 = vpop.eup %2605  ;;  %v1231_v23 = vmul.f32 %v1222_v61, %v1207_v7 }
 0x3b8   : > { %v1868_v47 = vsel %vm1864_vm3, %v2606_v46, 0.0  ;;  %v1851_v49 = vld [vmem:[#allocation4 + $0x18] sm:$0xff] }
 0x3b9   : > { %1878 = vperm.xlu1 %2588, %v1868_v47   ;;  %2611 = vrcp.f32 %v1851_v49 }
 0x3ba   : > { %v1227_v4 = vpop.permute.xlu1 %1226 }
 0x3bb   : > { %v2608_v50 = vpop.eup %2607  ;;  %v1232_v22 = vmul.f32 %v1227_v4, %v1208_v3 }
 0x3bc   : > { %v1869_v51 = vsel %vm1865_vm4, %v2608_v50, 0.0 }
 0x3bd   : > { %1883 = vperm.xlu0 %2587, %v1869_v51  }
 0x3bf   : > { %v2610_v53 = vpop.eup %2609 }
 0x3c0   : > { %v1870_v54 = vsel %vm1866_vm5, %v2610_v53, 0.0 }
 0x3c1   : > { %1888 = vperm.xlu1 %2588, %v1870_v54  }
 0x3c3   : > { %v2612_v57 = vpop.eup %2611 }
 0x3c4   : > { %v1871_v58 = vsel %vm1867_vm6, %v2612_v57, 0.0 }
 0x3c5   : > { %1904 = vperm.xlu1 %2588, %v1900_v56   ;;  %1893 = vperm.xlu0 %2587, %v1871_v58  }
 0x3c9   : > { %1909 = vperm.xlu0 %2587, %v1901_v59  }
 0x422   : > { %v2362_v5 = vpop.f32.mrb[0].mxu1 }
 0x423   : > { %v1834_v12 = vadd.f32 %v2362_v5, %v1230_v1  ;;  %v1811_v13 = vpop.f32.mrb[1].mxu1 }
 0x424   : > { %v1833_v19 = vadd.f32 %v1811_v13, %v1229_v2 }
 0x425   : > { %1838 = vst.msk [vmem:[#allocation5 + $0x8] sm:$0xff] %vm471_vm0, %v1834_v12 }
 0x426   : > { %1837 = vst.msk [vmem:[#allocation5] sm:$0xff] %vm471_vm0, %v1833_v19  ;;  %v2365_v24 = vpop.f32.mrb[2].mxu1 }
 0x427   : > { %v1836_v25 = vadd.f32 %v2365_v24, %v1232_v22  ;;  %v1823_v27 = vpop.f32.mrb[3].mxu1 }
 0x428   : > { %v1835_v28 = vadd.f32 %v1823_v27, %v1231_v23 }
 0x429   : > { %1840 = vst.msk [vmem:[#allocation5 + $0x18] sm:$0xff] %vm471_vm0, %v1836_v25 }
 0x42a   : > { %1839 = vst.msk [vmem:[#allocation5 + $0x10] sm:$0xff] %vm471_vm0, %v1835_v28 }
 0x42c   : > { %v1873_v17 = vld [vmem:[#allocation5 + $0x8] sm:$0xff] }
 0x42d   : > { %v1872_v18 = vld [vmem:[#allocation5] sm:$0xff] }
 0x430   : > { %v1875_v20 = vld [vmem:[#allocation5 + $0x18] sm:$0xff] }
 0x431   : > { %v1874_v30 = vld [vmem:[#allocation5 + $0x10] sm:$0xff] }
 0x438   : > { %v1879_v29 = vpop.permute.xlu1 %1878 }
 0x439   : > { %v1896_v6 = vmul.f32 %v1879_v29, %v1872_v18 }
 0x43c   : > { %v1884_v10 = vpop.permute.xlu0 %1883 }
 0x43d   : > { %v1897_v21 = vmul.f32 %v1884_v10, %v1873_v17 }
 0x440   : > { %v1889_v15 = vpop.permute.xlu1 %1888 }
 0x441   : > { %v1898_v8 = vmul.f32 %v1889_v15, %v1874_v30 }
 0x444   : > { %v1905_v9 = vpop.permute.xlu1 %1904  ;;  %v1894_v11 = vpop.permute.xlu0 %1893 }
 0x445   : > { %v1912_v14 = vmul.f32 %v1905_v9, %v1896_v6  ;;  %v1914_v16 = vmul.f32 %v1905_v9, %v1898_v8  ;;  %v1899_v31 = vmul.f32 %v1894_v11, %v1875_v20 }
 0x447   : > { %1916 = vst.msk [vmem:[%s452_s3] sm:$0xff] %vm471_vm0, %v1912_v14  ;;  %1918 = vst.msk [vmem:[%s452_s3 + $0x10] sm:$0xff] %vm471_vm0, %v1914_v16 }
 0x448   : > { %v1910_v32 = vpop.permute.xlu0 %1909 }
 0x449   : > { %v1913_v33 = vmul.f32 %v1910_v32, %v1897_v21  ;;  %v1915_v34 = vmul.f32 %v1910_v32, %v1899_v31 }
 0x44b   : > { %1917 = vst.msk [vmem:[%s452_s3 + $0x8] sm:$0xff] %vm471_vm0, %v1913_v33  ;;  %1919 = vst.msk [vmem:[%s452_s3 + $0x18] sm:$0xff] %vm471_vm0, %v1915_v34 }
 0x44c   : > { %2776 = shalt.err (!%p2773_p1)
}
 0x44d   : > { %s2777_s6 = scalar_lea.hbm %s3502_s11, 512  ;;  %s2781_s1 = scalar_lea.hbm %s3664_s16, 2048 }
 0x44e   : > { %p2778_p3 = scmp.ne.s32.totalorder %s3502_s11, %s2777_s6  ;;  %p2782_p8 = scmp.lt.u32.totalorder %s3502_s11, %s3664_s16 }
 0x44f   : > { %p2783_p2 = scmp.lt.u32.totalorder %s2781_s1, %s2777_s6  ;;  %p2785_p0 = scmp.lt.u32.totalorder %s2777_s6, %s3502_s11 }
 0x450   : > { %p2779_p6 = pnand %p2778_p3, %p3665_p12 }
 0x451   : > { %p2784_p10 = por %p2783_p2, %p2782_p8 }
 0x452   : > { %p2780_p5 = pneg %p2779_p6 }
 0x453   : > { %p2786_p4 = por %p2785_p0, %p2784_p10 }
 0x455   : > { %p2787_p9 = pnand %p2786_p4, %p2780_p5 }
 0x457   : > { %2790 = shalt.err (!%p2787_p9)
}
 0x458   : > { %s2906_s12 = smov 128   ;;  %s2907_s7 = smov 8  }
 0x459   : > { %2468 = dma.vmem_to_hbm [thread:$0]  (%p3665_p12), %s3495_s21, 512, %s3502_s11, %s1921_s23, %s2906_s12, %s2906_s12, %s2907_s7  }
 0x45a PF: > { %s3666_s5 = sld [smem:[#allocation26_spill]]  ;;  %s3667_s17 = sld [smem:[#allocation22_spill]] }
 0x45b   : > { %s3668_s30 = sld [smem:[#allocation34_spill]] }
 0x460   : > { %p2491_p13 = scmp.ge.s32.totalorder %s3666_s5, 2  ;;  %s1954_s3 = sand.u32 1, %s3667_s17  }
 0x461   : > { %p3669_p11 = scmp.ne.s32.totalorder %s3668_s30, 0  ;;  %s1955_s28 = scalar_lea.sflag [#allocation8], %s1954_s3 }
 0x463   : > { %p2487_p7 = pnand %p2491_p13, %p3669_p11 }
 0x465   : > { %2848 = dma.done.wait (!%p2487_p7), %s1955_s28, 512  }
 0x466   : > { %2850 = vsyncadd (!%p2487_p7), %s1955_s28, 4294966784  ;;  %s27_s28 = sadd.s32 1, %s3666_s5   ;;  %s3670_s18 = sld [smem:[#allocation20_spill]] }
 0x467   : > { %p24_p1 = scmp.ge.s32.totalorder %s27_s28, 6   ;;  %s3671_s19 = sld [smem:[#allocation21_spill]] }
 0x468   : > { %s3672_s20 = sld [smem:[#allocation32_spill]]  ;;  %s3673_s8 = sld [smem:[#allocation23_spill]] }
 0x469   : > { %s3674_s23 = sld [smem:[#allocation33_spill]]  ;;  %s3675_s11 = sld [smem:[#allocation27_spill]] }
 0x46a   : > { %s3676_s13 = sld [smem:[#allocation30_spill]]  ;;  %s3677_s21 = smov %s2869_s22 }
 0x46b   : > { %s3679_s24 = smov %s2885_s26  ;;  %s3680_s25 = smov %s2889_s27 }
 0x46c   :  { %26 = sbr.rel (!%p24_p1) target bundleno = 17 (0x11), region = 141 }
 0x46e   : > { %s3678_s22 = smov %s3673_s8 }
 0x46f   : > { %s3681_s26 = smov %s3675_s11 }
 0x470   : > { %s3682_s27 = smov %s3676_s13 }
 0x473   :  { %1960 = vsyncpa [#allocation7], 1 }
 0x474   :  { %1962 = vsyncpa [#allocation7 + $0x1], 1 }
 0x475   :  { %1963 = vsyncpa [#allocation10], 1 }
 0x476   :  { %1965 = vsyncpa [#allocation10 + $0x1], 1 }
 0x477   :  { %1966 = vsyncpa [#allocation13], 1 }
 0x478   :  { %1968 = vsyncpa [#allocation13 + $0x1], 1 }
 0x479   :  { %1969 = vsyncpa [#allocation8], 1 }
 0x47a   :  { %1971 = vsyncpa [#allocation8 + $0x1], 1 }

</bundles_post_ra>
